<compile_context>
chip_gen: v7x
topology: tpu7x:2x2x1
jax: 0.10.0
libtpu: 0.0.40
codegen_flags: <defaults>
</compile_context>

<pallas_src>
import functools
import math

import jax
import jax.numpy as jnp
from jax import lax
from jax.experimental import pallas as pl
from jax.experimental.pallas import tpu as pltpu

BN_EPS = 1e-5
ACT_DTYPE = jnp.bfloat16          # activations / weights on the MXU path
TM = 512                          # generic matmul M tile target
TM_CONV3 = 512                    # folded 3x3 conv M tile target
VMEM_LIMIT = 32 * 1024 * 1024     # sized for v7x's 64 MiB budget; fine on v5e/v6e too


def _round_up(x, m):
    return (x + m - 1) // m * m


def _pick_tn(n):
    return 256 if n % 256 == 0 else (128 if n % 128 == 0 else n)


def _pick_tk(k):
    return next((c for c in (512, 384, 256, 128) if k % c == 0), k)


# ----------------------------------------------------------------------------
# Kernel 1: tiled matmul + folded-BN affine + optional residual + optional ReLU
#           out = relu?( (A @ W) * scale + bias [+ residual] )
# ----------------------------------------------------------------------------
def _mm_kernel(*refs, relu, has_res):
    if has_res:
        a_ref, w_ref, s_ref, b_ref, r_ref, o_ref, acc_ref = refs
    else:
        a_ref, w_ref, s_ref, b_ref, o_ref, acc_ref = refs
        r_ref = None
    k = pl.program_id(2)

    @pl.when(k == 0)
    def _():
        acc_ref[...] = jnp.zeros_like(acc_ref)

    acc_ref[...] += jnp.dot(a_ref[...], w_ref[...],
                            preferred_element_type=jnp.float32)

    @pl.when(k == pl.num_programs(2) - 1)
    def _():
        out = acc_ref[...] * s_ref[...] + b_ref[...]
        if has_res:
            out = out + r_ref[...].astype(jnp.float32)
        if relu:
            out = jnp.maximum(out, 0.0)
        o_ref[...] = out.astype(o_ref.dtype)


@functools.partial(jax.jit, static_argnames=("relu",))
def matmul_affine(a, w, scale, bias, residual=None, relu=False):
    """a: (M, Ka), w: (K, N) bf16 (pre-packed), scale/bias: (1, N) f32."""
    M = a.shape[0]
    K, N = w.shape
    if a.shape[1] != K:                       # pre-padded weight K (e.g. stem 147 -> 256)
        a = jnp.pad(a, ((0, 0), (0, K - a.shape[1])))
    a = a.astype(ACT_DTYPE)

    tm = min(TM, _round_up(M, 8))
    tn = _pick_tn(N)
    tk = _pick_tk(K)
    Mp = _round_up(M, tm)
    if Mp != M:
        a = jnp.pad(a, ((0, Mp - M), (0, 0)))

    has_res = residual is not None
    inputs = [a, w, scale, bias]
    in_specs = [
        pl.BlockSpec((tm, tk), lambda i, j, k: (i, k)),
        pl.BlockSpec((tk, tn), lambda i, j, k: (k, j)),
        pl.BlockSpec((1, tn), lambda i, j, k: (0, j)),
        pl.BlockSpec((1, tn), lambda i, j, k: (0, j)),
    ]
    if has_res:
        r = residual.astype(ACT_DTYPE)
        if Mp != M:
            r = jnp.pad(r, ((0, Mp - M), (0, 0)))
        inputs.append(r)
        in_specs.append(pl.BlockSpec((tm, tn), lambda i, j, k: (i, j)))

    out = pl.pallas_call(
        functools.partial(_mm_kernel, relu=relu, has_res=has_res),
        out_shape=jax.ShapeDtypeStruct((Mp, N), ACT_DTYPE),
        grid_spec=pltpu.PrefetchScalarGridSpec(
            num_scalar_prefetch=0,
            grid=(Mp // tm, N // tn, K // tk),
            in_specs=in_specs,
            out_specs=pl.BlockSpec((tm, tn), lambda i, j, k: (i, j)),
            scratch_shapes=[pltpu.VMEM((tm, tn), jnp.float32)],
        ),
        compiler_params=pltpu.CompilerParams(
            dimension_semantics=("parallel", "parallel", "arbitrary"),
            vmem_limit_bytes=VMEM_LIMIT),
    )(*inputs)
    if Mp != M:
        out = out[:M]
    return out


# ----------------------------------------------------------------------------
# Kernel 2: stride-1 3x3 conv + folded BN + ReLU with the 9 taps folded into the
#           in-kernel reduction (no host-side im2col).  The padded NHWC input is
#           flattened to rows of C channels; for a fixed tap (i, j) the needed
#           row for output position q is simply q + i*Wp + j, so one halo'ed slab
#           DMA per M-block feeds all 9 taps via static row offsets.
# ----------------------------------------------------------------------------
def _conv3_kernel(abig_ref, w_ref, s_ref, b_ref, o_ref, slab_ref, acc_ref, sem,
                  *, tm, halo, offs, relu):
    jn = pl.program_id(1)
    m0 = pl.program_id(0) * tm

    @pl.when(jn == 0)  # slab is reused across all Cout tiles of this M-block
    def _():
        cp = pltpu.make_async_copy(
            abig_ref.at[pl.ds(m0, tm + 2 * halo), :], slab_ref, sem.at[0])
        cp.start()
        cp.wait()

    acc_ref[...] = jnp.zeros_like(acc_ref)
    for t in range(9):                                   # static unroll over taps
        a_t = slab_ref[pl.ds(offs[t], tm), :]            # (tm, Cin)
        acc_ref[...] += jnp.dot(a_t, w_ref[t],
                                preferred_element_type=jnp.float32)

    out = acc_ref[...] * s_ref[...] + b_ref[...]
    if relu:
        out = jnp.maximum(out, 0.0)
    o_ref[...] = out.astype(o_ref.dtype)


@functools.partial(jax.jit, static_argnames=("relu",))
def conv3x3_s1(x, w9, scale, bias, relu=False):
    """x: (N, H, W, Cin) bf16; w9: (9, Cin, Cout) bf16. stride=1, pad=1."""
    N, H, W, Cin = x.shape
    Cout = w9.shape[2]
    Hp, Wp = H + 2, W + 2
    halo = Wp + 1
    Mi = N * Hp * Wp                               # output computed on padded coords
    tm = min(TM_CONV3, _round_up(Mi, 8))
    Mp = _round_up(Mi, tm)
    tn = _pick_tn(Cout)

    xp = jnp.pad(x.astype(ACT_DTYPE), ((0, 0), (1, 1), (1, 1), (0, 0)))
    abig = jnp.pad(xp.reshape(Mi, Cin), ((halo, Mp + halo - Mi), (0, 0)))
    offs = tuple(i * Wp + j for i in range(3) for j in range(3))

    out = pl.pallas_call(
        functools.partial(_conv3_kernel, tm=tm, halo=halo, offs=offs, relu=relu),
        out_shape=jax.ShapeDtypeStruct((Mp, Cout), ACT_DTYPE),
        grid_spec=pltpu.PrefetchScalarGridSpec(
            num_scalar_prefetch=0,
            grid=(Mp // tm, Cout // tn),
            in_specs=[
                pl.BlockSpec(memory_space=pl.ANY),                    # activation slab in HBM
                pl.BlockSpec((9, Cin, tn), lambda i, j: (0, 0, j)),
                pl.BlockSpec((1, tn), lambda i, j: (0, j)),
                pl.BlockSpec((1, tn), lambda i, j: (0, j)),
            ],
            out_specs=pl.BlockSpec((tm, tn), lambda i, j: (i, j)),
            scratch_shapes=[
                pltpu.VMEM((tm + 2 * halo, Cin), ACT_DTYPE),
                pltpu.VMEM((tm, tn), jnp.float32),
                pltpu.SemaphoreType.DMA((1,)),
            ],
        ),
        compiler_params=pltpu.CompilerParams(
            dimension_semantics=("parallel", "arbitrary"),
            vmem_limit_bytes=VMEM_LIMIT),
    )(abig, w9, scale, bias)
    out = out[:Mi].reshape(N, Hp, Wp, Cout)[:, 1:1 + H, 1:1 + W, :]
    return out


# ----------------------------------------------------------------------------
# Kernel 3: flash-style non-local attention  y = softmax(theta @ phi^T) @ g
# ----------------------------------------------------------------------------
def _flash_kernel(q_ref, kt_ref, g_ref, o_ref, m_sc, l_sc, acc_sc, *, n_valid, tkk):
    kb = pl.program_id(2)

    @pl.when(kb == 0)
    def _():
        m_sc[...] = jnp.full_like(m_sc, -jnp.inf)
        l_sc[...] = jnp.zeros_like(l_sc)
        acc_sc[...] = jnp.zeros_like(acc_sc)

    s = jnp.dot(q_ref[0], kt_ref[0], preferred_element_type=jnp.float32)  # (tq, tkk)
    col = kb * tkk + lax.broadcasted_iota(jnp.int32, s.shape, 1)
    s = jnp.where(col < n_valid, s, -1e30)                                # mask padded keys

    m_prev = m_sc[...]
    m_new = jnp.maximum(m_prev, jnp.max(s, axis=-1, keepdims=True))
    alpha = jnp.exp(m_prev - m_new)
    p = jnp.exp(s - m_new)
    l_sc[...] = alpha * l_sc[...] + jnp.sum(p, axis=-1, keepdims=True)
    acc_sc[...] = alpha * acc_sc[...] + jnp.dot(
        p.astype(g_ref.dtype), g_ref[0], preferred_element_type=jnp.float32)
    m_sc[...] = m_new

    @pl.when(kb == pl.num_programs(2) - 1)
    def _():
        o_ref[0] = (acc_sc[...] *
                    pl.reciprocal(l_sc[...], approx=True)).astype(o_ref.dtype)


@functools.partial(jax.jit, static_argnames=("n_valid",))
def flash_attention(theta, phi_t, g, n_valid):
    """theta,g: (B, Np, Cp); phi_t: (B, Cp, Np)  (bf16, Np >= n_valid)."""
    B, Np, Cp = theta.shape
    tq = 128 if Np % 128 == 0 else Np
    tkk = 256 if Np % 256 == 0 else (128 if Np % 128 == 0 else Np)

    return pl.pallas_call(
        functools.partial(_flash_kernel, n_valid=n_valid, tkk=tkk),
        out_shape=jax.ShapeDtypeStruct((B, Np, Cp), ACT_DTYPE),
        grid_spec=pltpu.PrefetchScalarGridSpec(
            num_scalar_prefetch=0,
            grid=(B, Np // tq, Np // tkk),
            in_specs=[
                pl.BlockSpec((1, tq, Cp), lambda b, qi, ki: (b, qi, 0)),
                pl.BlockSpec((1, Cp, tkk), lambda b, qi, ki: (b, 0, ki)),
                pl.BlockSpec((1, tkk, Cp), lambda b, qi, ki: (b, ki, 0)),
            ],
            out_specs=pl.BlockSpec((1, tq, Cp), lambda b, qi, ki: (b, qi, 0)),
            scratch_shapes=[pltpu.VMEM((tq, 1), jnp.float32),
                            pltpu.VMEM((tq, 1), jnp.float32),
                            pltpu.VMEM((tq, Cp), jnp.float32)],
        ),
        compiler_params=pltpu.CompilerParams(
            dimension_semantics=("parallel", "parallel", "arbitrary"),
            vmem_limit_bytes=VMEM_LIMIT),
    )(theta, phi_t, g)


# ----------------------------------------------------------------------------
# Host-side glue (NHWC everywhere)
# ----------------------------------------------------------------------------
def _im2col_nhwc(x, kh, kw, stride, pad):
    # TODO(synk): only the 7x7 stem and the two stride-2 3x3 convs use this path;
    # stride-1 3x3 convs are fully folded into the conv3x3_s1 kernel.
    N, H, W, C = x.shape
    xp = jnp.pad(x, ((0, 0), (pad, pad), (pad, pad), (0, 0)))
    Ho = (H + 2 * pad - kh) // stride + 1
    Wo = (W + 2 * pad - kw) // stride + 1
    cols = [xp[:, i:i + stride * Ho:stride, j:j + stride * Wo:stride, :]
            for i in range(kh) for j in range(kw)]
    a = jnp.concatenate(cols, axis=-1)                    # (N, Ho, Wo, kh*kw*C)
    return a.reshape(N * Ho * Wo, kh * kw * C), Ho, Wo


def stem_forward(x, params):
    # conv1 7x7/s2 + bn1 (no ReLU in the reference forward) + MaxPool2d(3, 2, 1)
    N = x.shape[0]
    a, Ho, Wo = _im2col_nhwc(x, 7, 7, 2, 3)
    out = matmul_affine(a, params["conv1_w"], params["conv1_s"], params["conv1_b"])
    out = out.reshape(N, Ho, Wo, 64)
    # TODO(synk): MaxPool2d stays as plain-JAX reduce_window (no Pallas kernel).
    out = lax.reduce_window(out, jnp.array(-jnp.inf, out.dtype), lax.max,
                            (1, 3, 3, 1), (1, 2, 2, 1),
                            padding=((0, 0), (1, 1), (1, 1), (0, 0)))
    return out


def bottleneck_forward(x, p):
    N, H, W, Cin = x.shape
    stride = p["stride"]

    if "ds_w" in p:
        xs = x[:, ::stride, ::stride, :] if stride > 1 else x
        res = matmul_affine(xs.reshape(-1, Cin), p["ds_w"], p["ds_s"], p["ds_b"])
    else:
        res = x.reshape(-1, Cin)

    planes = p["conv1_w"].shape[1]
    out = matmul_affine(x.reshape(-1, Cin), p["conv1_w"], p["conv1_s"], p["conv1_b"],
                        relu=True).reshape(N, H, W, planes)

    if stride == 1:
        out = conv3x3_s1(out, p["conv2_w9"], p["conv2_s"], p["conv2_b"], relu=True)
        Ho, Wo = H, W
    else:
        a, Ho, Wo = _im2col_nhwc(out, 3, 3, stride, 1)
        out = matmul_affine(a, p["conv2_w"], p["conv2_s"], p["conv2_b"],
                            relu=True).reshape(N, Ho, Wo, planes)

    Cout = p["conv3_w"].shape[1]
    z = matmul_affine(out.reshape(-1, planes), p["conv3_w"], p["conv3_s"], p["conv3_b"],
                      residual=res, relu=True)
    return z.reshape(N, Ho, Wo, Cout)


def nonlocal_forward(x, p, B, T):
    # x: (B*T, H, W, C) NHWC -> positions (T, H, W) per batch; reshape is free.
    BT, H, W, C = x.shape
    Npos = T * H * W
    inter = p["g_w"].shape[1]
    xf = x.reshape(B * Npos, C)

    ones = p["ones_inter"]
    g_x = matmul_affine(xf, p["g_w"], ones, p["g_b"])
    th_x = matmul_affine(xf, p["theta_w"], ones, p["theta_b"])
    ph_x = matmul_affine(xf, p["phi_w"], ones, p["phi_b"])

    Npp = _round_up(Npos, 8)

    def to_bnp(t):
        t = t.reshape(B, Npos, inter)
        if Npp != Npos:
            t = jnp.pad(t, ((0, 0), (0, Npp - Npos), (0, 0)))
        return t

    theta_b = to_bnp(th_x)
    g_b = to_bnp(g_x)
    phi_t = jnp.transpose(to_bnp(ph_x), (0, 2, 1))       # (B, inter, Npp), MXU-friendly

    y = flash_attention(theta_b, phi_t, g_b, n_valid=Npos)
    y = y[:, :Npos, :].reshape(B * Npos, inter)

    z = matmul_affine(y, p["W_w"], p["W_s"], p["W_b"], residual=xf)
    return z.reshape(BT, H, W, C)


def resnet_video_nonlocal_forward(params, x):
    # x: (B, T, 3, H, W) -> (B, 2048, T, H/16, W/16) for last_stride=1
    B, T, C, H, W = x.shape
    x = x.reshape(B * T, C, H, W)
    x = jnp.transpose(x, (0, 2, 3, 1)).astype(ACT_DTYPE)   # NHWC, bf16

    x = stem_forward(x, params)

    def run_stage(x, blocks, nl_blocks, nl_idx):
        counter = 0
        for i, bp in enumerate(blocks):
            x = bottleneck_forward(x, bp)
            if counter < len(nl_blocks) and i == nl_idx[counter]:
                x = nonlocal_forward(x, nl_blocks[counter], B, T)
                counter += 1
        return x

    for li in range(4):
        x = run_stage(x, params[f"layer{li + 1}"],
                      params[f"NL_{li + 1}"], params[f"NL_{li + 1}_idx"])

    BT, Hc, Wc, Cc = x.shape
    x = x.reshape(B, T, Hc, Wc, Cc)
    return jnp.transpose(x, (0, 4, 1, 2, 3)).astype(jnp.float32)


# ----------------------------------------------------------------------------
# Parameter construction (deterministic; weights / folded BN pre-packed for the kernels)
# ----------------------------------------------------------------------------
class KeyGen:
    def __init__(self, key):
        self.key = key
        self.i = 0

    def __call__(self):
        self.i += 1
        return jax.random.fold_in(self.key, self.i)


def _fold_bn(gamma, beta, mean, var, conv_bias=None):
    scale = gamma / jnp.sqrt(var + BN_EPS)
    bias = beta - mean * scale
    if conv_bias is not None:
        bias = bias + conv_bias * scale
    return (scale.reshape(1, -1).astype(jnp.float32),
            bias.reshape(1, -1).astype(jnp.float32))


def _bn_identity(c, gamma=1.0):
    return _fold_bn(jnp.full((c,), gamma, jnp.float32), jnp.zeros((c,), jnp.float32),
                    jnp.zeros((c,), jnp.float32), jnp.ones((c,), jnp.float32))


def _w1x1(kg, cin, cout):
    std = math.sqrt(2.0 / cin)
    w = jax.random.normal(kg(), (cout, cin), jnp.float32) * std
    return jnp.transpose(w).astype(ACT_DTYPE)                     # (cin, cout)


def _w_conv_packed(kg, cout, cin, kh, kw):
    std = math.sqrt(2.0 / (cin * kh * kw))
    w = jax.random.normal(kg(), (cout, cin, kh, kw), jnp.float32) * std
    wm = jnp.transpose(w, (2, 3, 1, 0)).reshape(kh * kw * cin, cout)
    K = wm.shape[0]
    if K % 128 != 0 and K > 128:                                  # pre-pad K once at init
        wm = jnp.pad(wm, ((0, _round_up(K, 128) - K), (0, 0)))
    return wm.astype(ACT_DTYPE)


def _w3x3_folded(kg, cout, cin):
    std = math.sqrt(2.0 / (cin * 9))
    w = jax.random.normal(kg(), (cout, cin, 3, 3), jnp.float32) * std
    return jnp.transpose(w, (2, 3, 1, 0)).reshape(9, cin, cout).astype(ACT_DTYPE)


def init_bottleneck(kg, inplanes, planes, stride, with_ds):
    p = {"stride": stride}
    p["conv1_w"] = _w1x1(kg, inplanes, planes)
    p["conv1_s"], p["conv1_b"] = _bn_identity(planes)
    if stride == 1:
        p["conv2_w9"] = _w3x3_folded(kg, planes, planes)
    else:
        p["conv2_w"] = _w_conv_packed(kg, planes, planes, 3, 3)
    p["conv2_s"], p["conv2_b"] = _bn_identity(planes)
    p["conv3_w"] = _w1x1(kg, planes, planes * 4)
    p["conv3_s"], p["conv3_b"] = _bn_identity(planes * 4)
    if with_ds:
        p["ds_w"] = _w1x1(kg, inplanes, planes * 4)
        p["ds_s"], p["ds_b"] = _bn_identity(planes * 4)
    return p


def init_nonlocal(kg, c, inter):
    def conv1(cin, cout):
        std = math.sqrt(2.0 / cin)
        w = jax.random.normal(kg(), (cout, cin), jnp.float32) * std
        b = jax.random.normal(kg(), (cout,), jnp.float32) * 0.01
        return jnp.transpose(w).astype(ACT_DTYPE), b.reshape(1, -1).astype(jnp.float32)

    p = {}
    p["g_w"], p["g_b"] = conv1(c, inter)
    p["theta_w"], p["theta_b"] = conv1(c, inter)
    p["phi_w"], p["phi_b"] = conv1(c, inter)
    W_w, W_b = conv1(inter, c)
    p["W_w"] = W_w
    # NonLocalBlock.__init__ sets the final BN weight/bias to 0; fold conv bias through it.
    p["W_s"], p["W_b"] = _fold_bn(jnp.zeros((c,), jnp.float32), jnp.zeros((c,), jnp.float32),
                                  jnp.zeros((c,), jnp.float32), jnp.ones((c,), jnp.float32),
                                  conv_bias=W_b.reshape(-1))
    p["ones_inter"] = jnp.ones((1, inter), jnp.float32)
    return p


def init_model(key, layers=(3, 4, 6, 3), non_layers=(0, 1, 1, 1), last_stride=1):
    kg = KeyGen(key)
    params = {"conv1_w": _w_conv_packed(kg, 64, 3, 7, 7)}
    params["conv1_s"], params["conv1_b"] = _bn_identity(64)

    inplanes = 64
    strides = (1, 2, 2, last_stride)
    planes_list = (64, 128, 256, 512)
    for li in range(4):
        planes, blocks, stride = planes_list[li], layers[li], strides[li]
        with_ds = stride != 1 or inplanes != planes * 4
        layer = [init_bottleneck(kg, inplanes, planes, stride, with_ds)]
        inplanes = planes * 4
        for _ in range(1, blocks):
            layer.append(init_bottleneck(kg, inplanes, planes, 1, False))
        params[f"layer{li + 1}"] = layer
        # TODO(synk): NL_1 (sub_sample=True) would need a MaxPool3d(1,2,2) branch on phi/g;
        # with non_layers[0]=0 (module default) it is never instantiated.
        params[f"NL_{li + 1}"] = [init_nonlocal(kg, inplanes, inplanes // 2)
                                  for _ in range(non_layers[li])]
        params[f"NL_{li + 1}_idx"] = sorted(
            [blocks - (i + 1) for i in range(non_layers[li])])
    return params


if __name__ == "__main__":
    key = jax.random.PRNGKey(0)
    params = init_model(key)   # layers=[3,4,6,3], non_layers=[0,1,1,1], last_stride=1
    B, T, C, H, W = 2, 2, 3, 32, 32
    x = jax.random.normal(jax.random.fold_in(key, 12345), (B, T, C, H, W), jnp.float32)
    out = resnet_video_nonlocal_forward(params, x)
    out = jax.block_until_ready(out)
    expected = (B, 2048, T, H // 16, W // 16)
    assert out.shape == expected, (out.shape, expected)
    assert bool(jnp.all(jnp.isfinite(out))), "non-finite output"
    print("KERNEL_OK")
</pallas_src>

<mosaic_0001>
module attributes {stable_mosaic.version = 11 : i64} {
  func.func @_mm_kernel(%arg0: i32, %arg1: i32, %arg2: i32, %arg3: memref<512x256xbf16, #tpu.memory_space<vmem>>, %arg4: memref<256x64xbf16, #tpu.memory_space<vmem>>, %arg5: memref<1x64xf32, #tpu.memory_space<vmem>>, %arg6: memref<1x64xf32, #tpu.memory_space<vmem>>, %arg7: memref<512x64xbf16, #tpu.memory_space<vmem>>, %arg8: memref<512x64xf32, #tpu.memory_space<vmem>>) attributes {dimension_semantics = [#tpu.dimension_semantics<parallel>, #tpu.dimension_semantics<parallel>, #tpu.dimension_semantics<arbitrary>], iteration_bounds = array<i64: 2, 1, 1>, scalar_prefetch = 0 : i64, scratch_operands = 1 : i64, tpu.core_type = #tpu.core_type<tc>, window_params = [{transform_indices = @transform_0, window_bounds = array<i64: 512, 256>}, {transform_indices = @transform_1, window_bounds = array<i64: 256, 64>}, {transform_indices = @transform_2, window_bounds = array<i64: 1, 64>}, {transform_indices = @transform_3, window_bounds = array<i64: 1, 64>}, {transform_indices = @transform_4, window_bounds = array<i64: 512, 64>}]} {
    %c0_i32 = arith.constant 0 : i32
    %0 = arith.cmpi eq, %arg2, %c0_i32 : i32
    %1 = arith.extui %0 : i1 to i32
    %c0_i32_0 = arith.constant 0 : i32
    %2 = arith.cmpi ne, %1, %c0_i32_0 : i32
    scf.if %2 {
      %cst_10 = arith.constant 0.000000e+00 : f32
      %12 = vector.broadcast %cst_10 : f32 to vector<512x64xf32>
      %c0_11 = arith.constant 0 : index
      %c0_12 = arith.constant 0 : index
      %13 = vector.load %arg8[%c0_11, %c0_12] : memref<512x64xf32, #tpu.memory_space<vmem>>, vector<512x64xf32>
      tpu.vector_store %arg8[%c0_11, %c0_12], %12 {strides = array<i32>} : memref<512x64xf32, #tpu.memory_space<vmem>>, vector<512x64xf32>,
    } else {
    }
    %c0 = arith.constant 0 : index
    %c0_1 = arith.constant 0 : index
    %3 = vector.load %arg8[%c0, %c0_1] : memref<512x64xf32, #tpu.memory_space<vmem>>, vector<512x64xf32>
    %c0_2 = arith.constant 0 : index
    %c0_3 = arith.constant 0 : index
    %4 = vector.load %arg3[%c0_2, %c0_3] : memref<512x256xbf16, #tpu.memory_space<vmem>>, vector<512x256xbf16>
    %c0_4 = arith.constant 0 : index
    %c0_5 = arith.constant 0 : index
    %5 = vector.load %arg4[%c0_4, %c0_5] : memref<256x64xbf16, #tpu.memory_space<vmem>>, vector<256x64xbf16>
    %cst = arith.constant dense<0.000000e+00> : vector<512x64xf32>
    %6 = tpu.matmul %4, %5, %cst {dimension_numbers = #tpu.dot_dimension_numbers<[1], [0], [0], [1], [0, 0, 1, 1], [], []>} : vector<512x256xbf16>, vector<256x64xbf16>, vector<512x64xf32> -> vector<512x64xf32>
    %7 = arith.addf %3, %6 : vector<512x64xf32>
    %c0_6 = arith.constant 0 : index
    %c0_7 = arith.constant 0 : index
    %8 = vector.load %arg8[%c0_6, %c0_7] : memref<512x64xf32, #tpu.memory_space<vmem>>, vector<512x64xf32>
    tpu.vector_store %arg8[%c0_6, %c0_7], %7 {strides = array<i32>} : memref<512x64xf32, #tpu.memory_space<vmem>>, vector<512x64xf32>,
    %c0_i32_8 = arith.constant 0 : i32
    %9 = arith.cmpi eq, %arg2, %c0_i32_8 : i32
    %10 = arith.extui %9 : i1 to i32
    %c0_i32_9 = arith.constant 0 : i32
    %11 = arith.cmpi ne, %10, %c0_i32_9 : i32
    scf.if %11 {
      %c0_10 = arith.constant 0 : index
      %c0_11 = arith.constant 0 : index
      %12 = vector.load %arg8[%c0_10, %c0_11] : memref<512x64xf32, #tpu.memory_space<vmem>>, vector<512x64xf32>
      %c0_12 = arith.constant 0 : index
      %c0_13 = arith.constant 0 : index
      %13 = vector.load %arg5[%c0_12, %c0_13] : memref<1x64xf32, #tpu.memory_space<vmem>>, vector<1x64xf32>
      %14 = vector.broadcast %13 : vector<1x64xf32> to vector<512x64xf32>
      %15 = arith.mulf %12, %14 : vector<512x64xf32>
      %c0_14 = arith.constant 0 : index
      %c0_15 = arith.constant 0 : index
      %16 = vector.load %arg6[%c0_14, %c0_15] : memref<1x64xf32, #tpu.memory_space<vmem>>, vector<1x64xf32>
      %17 = vector.broadcast %16 : vector<1x64xf32> to vector<512x64xf32>
      %18 = arith.addf %15, %17 : vector<512x64xf32>
      %19 = arith.truncf %18 : vector<512x64xf32> to vector<512x64xbf16>
      %c0_16 = arith.constant 0 : index
      %c0_17 = arith.constant 0 : index
      %20 = vector.load %arg7[%c0_16, %c0_17] : memref<512x64xbf16, #tpu.memory_space<vmem>>, vector<512x64xbf16>
      tpu.vector_store %arg7[%c0_16, %c0_17], %19 {strides = array<i32>} : memref<512x64xbf16, #tpu.memory_space<vmem>>, vector<512x64xbf16>,
    } else {
    }
    return
  }
  func.func @transform_0(%arg0: i32, %arg1: i32, %arg2: i32) -> (i32, i32) {
    %c0_i32 = arith.constant 0 : i32
    return %arg0, %arg2 : i32, i32
  }
  func.func @transform_1(%arg0: i32, %arg1: i32, %arg2: i32) -> (i32, i32) {
    %c0_i32 = arith.constant 0 : i32
    return %arg2, %arg1 : i32, i32
  }
  func.func @transform_2(%arg0: i32, %arg1: i32, %arg2: i32) -> (i32, i32) {
    %c0_i32 = arith.constant 0 : i32
    %c0_i32_0 = arith.constant 0 : i32
    return %c0_i32, %arg1 : i32, i32
  }
  func.func @transform_3(%arg0: i32, %arg1: i32, %arg2: i32) -> (i32, i32) {
    %c0_i32 = arith.constant 0 : i32
    %c0_i32_0 = arith.constant 0 : i32
    return %c0_i32, %arg1 : i32, i32
  }
  func.func @transform_4(%arg0: i32, %arg1: i32, %arg2: i32) -> (i32, i32) {
    %c0_i32 = arith.constant 0 : i32
    return %arg0, %arg1 : i32, i32
  }
}

</mosaic_0001>

<bundles_post_ra>
// kernel: matmul_affine.1
= control target key start
LH: loop header
LB: loop body
LE: loop exit
PB: predicated region body
PF: predicated region fallthrough
CT: control target
= control target key end

     0   :  { %s2477_s15 = smov 0   ;;  %s2479_s16 = smov 0   ;;  %s3134_s0 = inlined_call_operand.vmem [shape: bf16[1024,256], index: 0, kind: input, shape index: {}]   ;;  %s3135_s1 = inlined_call_operand.vmem [shape: bf16[256,64], index: 1, kind: input, shape index: {}]   ;;  %s3136_s2 = inlined_call_operand.vmem [shape: f32[1,64], index: 2, kind: input, shape index: {}]   ;;  %s3137_s3 = inlined_call_operand.vmem [shape: f32[1,64], index: 3, kind: input, shape index: {}]   ;;  %s3138_s4 = inlined_call_operand.vmem [shape: bf16[1024,64], index: 4, kind: output, shape index: {}]  }
   0x1   :  { %s2481_s17 = smov 0  }
   0x2 LB: > { %s33_s18 = sadd.s32 1, %s2444_s16  ;;  %p2035_p0 = scmp.ge.s32.totalorder %s2448_s17, 1  ;;  %s2448_s17 = sphi %s2481_s17, %s14_s17   ;;  %s2444_s16 = sphi %s2479_s16, %s3140_s16   ;;  %s2440_s15 = sphi %s2477_s15, %s3139_s15  }
   0x3   : > { %p35_p1 = scmp.ge.s32.totalorder %s33_s18, 2  ;;  %p224_p2 = scmp.lt.s32.totalorder %s2448_s17, 3 }
   0x5   : > { %s3142_s18 = smov (%p35_p1, %s33_s18), 0  ;;  %p225_p3 = pnand %p2035_p0, %p224_p2 }
   0x6   : > { %v2312_v0 = vld [vmem:[%s3135_s1] sm:$0xff] (!%p225_p3)   ;;  %v2450_v1 = vmov (!%p225_p3), 0   ;;  %s2036_s21 = sshll.u32 (!%p225_p3), %s2440_s15, 6  ;;  %v2313_v2 = vld [vmem:[%s3135_s1 + $0x8] sm:$0xff] (!%p225_p3)   ;;  %v2314_v3 = vld [vmem:[%s3135_s1 + $0x10] sm:$0xff] (!%p225_p3)   ;;  %vm313_vm0 = vcmask (!%p225_p3), 523264  }
   0x7   : > { %228 = sbr.rel (%p225_p3) target bundleno = 425 (0x1a9), region = 36  ;;  %954 = vmatprep.subr.bf16.mxu0 (!%p225_p3), %v2450_v1  ;;  %2254 = vmatprep.subr.bf16.mxu1 (!%p225_p3), %v2450_v1  ;;  %p274_p4 = scmp.lt.s32.totalorder (!%p225_p3), %s2036_s21, 127  ;;  %v2315_v4 = vld [vmem:[%s3135_s1 + $0x18] sm:$0xff] (!%p225_p3)   ;;  %v2316_v5 = vld [vmem:[%s3135_s1 + $0x20] sm:$0xff] (!%p225_p3)   ;;  %v2317_v7 = vld [vmem:[%s3135_s1 + $0x28] sm:$0xff] (!%p225_p3)   ;;  %v2451_v19 = vmov (!%p225_p3), 0.0  }
   0x8   : > { %955 = vmatpush1.bf16.msra.mxu0 (!%p225_p3), %v2312_v0  ;;  %2270 = vmatpush1.bf16.msra.mxu1 (!%p225_p3), %v2312_v0  ;;  %v2318_v9 = vld [vmem:[%s3135_s1 + $0x30] sm:$0xff] (!%p225_p3)   ;;  %v2319_v10 = vld [vmem:[%s3135_s1 + $0x38] sm:$0xff] (!%p225_p3)   ;;  %v2320_v11 = vld [vmem:[%s3135_s1 + $0x40] sm:$0xff] (!%p225_p3)   ;;  %314 = vst.msk [vmem:[#allocation2] sm:$0xff] (!%p225_p3), %vm313_vm0, %v2451_v19  ;;  %vm1837_vm1 = vcmask (!%p225_p3), 519168  }
   0x9   : > { %956 = vmatprep.subr.bf16.mxu0 (!%p225_p3), %v2450_v1  ;;  %2255 = vmatprep.subr.bf16.mxu1 (!%p225_p3), %v2450_v1  ;;  %v2321_v12 = vld [vmem:[%s3135_s1 + $0x48] sm:$0xff] (!%p225_p3)   ;;  %v2322_v13 = vld [vmem:[%s3135_s1 + $0x50] sm:$0xff] (!%p225_p3)   ;;  %v2323_v14 = vld [vmem:[%s3135_s1 + $0x58] sm:$0xff] (!%p225_p3)   ;;  %315 = vst.msk [vmem:[#allocation2 + $0x8] sm:$0xff] (!%p225_p3), %vm313_vm0, %v2451_v19 }
   0xa   : > { %v2324_v15 = vld [vmem:[%s3135_s1 + $0x60] sm:$0xff] (!%p225_p3)   ;;  %v2325_v16 = vld [vmem:[%s3135_s1 + $0x68] sm:$0xff] (!%p225_p3)   ;;  %v2326_v17 = vld [vmem:[%s3135_s1 + $0x70] sm:$0xff] (!%p225_p3)   ;;  %316 = vst.msk [vmem:[#allocation2 + $0x10] sm:$0xff] (!%p225_p3), %vm313_vm0, %v2451_v19 }
   0xb   : > { %v2583_v18 = vld [vmem:[%s3135_s1 + $0x78] sm:$0xff] (!%p225_p3)   ;;  %317 = vst.msk [vmem:[#allocation2 + $0x18] sm:$0xff] (!%p225_p3), %vm313_vm0, %v2451_v19  ;;  %318 = vst.msk [vmem:[#allocation2 + $0x20] sm:$0xff] (!%p225_p3), %vm313_vm0, %v2451_v19 }
   0xc   : > { %957 = vmatpush1.bf16.msra.mxu0 (!%p225_p3), %v2313_v2  ;;  %2271 = vmatpush1.bf16.msra.mxu1 (!%p225_p3), %v2313_v2  ;;  %319 = vst.msk [vmem:[#allocation2 + $0x28] sm:$0xff] (!%p225_p3), %vm313_vm0, %v2451_v19  ;;  %320 = vst.msk [vmem:[#allocation2 + $0x30] sm:$0xff] (!%p225_p3), %vm313_vm0, %v2451_v19 }
   0xd   : > { %958 = vmatprep.subr.bf16.mxu0 (!%p225_p3), %v2450_v1  ;;  %2256 = vmatprep.subr.bf16.mxu1 (!%p225_p3), %v2450_v1  ;;  %321 = vst.msk [vmem:[#allocation2 + $0x38] sm:$0xff] (!%p225_p3), %vm313_vm0, %v2451_v19  ;;  %322 = vst.msk [vmem:[#allocation2 + $0x40] sm:$0xff] (!%p225_p3), %vm313_vm0, %v2451_v19 }
   0xe   : > { %s3144_s21 = smov (!%p274_p4, %s2036_s21), 127  ;;  %323 = vst.msk [vmem:[#allocation2 + $0x48] sm:$0xff] %vm313_vm0, %v2451_v19  ;;  %324 = vst.msk [vmem:[#allocation2 + $0x50] sm:$0xff] %vm313_vm0, %v2451_v19 }
   0xf   : > { %s2189_s28 = sshll.u32 %s3144_s21, 3  ;;  %325 = vst.msk [vmem:[#allocation2 + $0x58] sm:$0xff] %vm313_vm0, %v2451_v19  ;;  %326 = vst.msk [vmem:[#allocation2 + $0x60] sm:$0xff] %vm313_vm0, %v2451_v19  ;;  %s2040_s12 = sshll.u32 %s3144_s21, 2 }
  0x10   : > { %959 = vmatpush1.bf16.msra.mxu0 %v2314_v3  ;;  %2272 = vmatpush1.bf16.msra.mxu1 %v2314_v3  ;;  %s2524_s7 = scalar_lea.vmem %s3134_s0, %s2189_s28  ;;  %327 = vst.msk [vmem:[#allocation2 + $0x68] sm:$0xff] %vm313_vm0, %v2451_v19  ;;  %328 = vst.msk [vmem:[#allocation2 + $0x70] sm:$0xff] %vm313_vm0, %v2451_v19  ;;  %s2807_s14 = scalar_lea.vmem %s3138_s4, %s2040_s12 }
  0x11   : > { %960 = vmatprep.subr.bf16.mxu0 %v2450_v1  ;;  %2257 = vmatprep.subr.bf16.mxu1 %v2450_v1  ;;  %v2330_v6 = vld [vmem:[%s2524_s7 + $0x4] ss:$8 sps:$4 sm:$0xff]   ;;  %329 = vst.msk [vmem:[#allocation2 + $0x78] sm:$0xff] %vm313_vm0, %v2451_v19  ;;  %330 = vst.msk [vmem:[#allocation2 + $0x80] sm:$0xff] %vm313_vm0, %v2451_v19  ;;  %v2328_v20 = vld [vmem:[%s2524_s7] ss:$8 sps:$4 sm:$0xff]  }
  0x12   : > { %v2333_v8 = vld [vmem:[%s2524_s7 + $0x104] ss:$8 sps:$4 sm:$0xff]   ;;  %986 = vmatprep.mubr.bf16.mxu0 %v2330_v6  ;;  %331 = vst.msk [vmem:[#allocation2 + $0x88] sm:$0xff] %vm313_vm0, %v2451_v19  ;;  %332 = vst.msk [vmem:[#allocation2 + $0x90] sm:$0xff] %vm313_vm0, %v2451_v19  ;;  %v2331_v21 = vld [vmem:[%s2524_s7 + $0x100] ss:$8 sps:$4 sm:$0xff]  }
  0x13   : > { %1114 = vmatprep.mubr.bf16.mxu1 %v2333_v8  ;;  %333 = vst.msk [vmem:[#allocation2 + $0x98] sm:$0xff] %vm313_vm0, %v2451_v19  ;;  %334 = vst.msk [vmem:[#allocation2 + $0xa0] sm:$0xff] %vm313_vm0, %v2451_v19  ;;  %v2334_v22 = vld [vmem:[%s2524_s7 + $0x14] ss:$8 sps:$4 sm:$0xff]   ;;  %v2338_v24 = vld [vmem:[%s2524_s7 + $0x10] ss:$8 sps:$4 sm:$0xff]  }
  0x14   : > { %961 = vmatpush1.bf16.msra.mxu0 %v2315_v4  ;;  %2273 = vmatpush1.bf16.msra.mxu1 %v2315_v4  ;;  %335 = vst.msk [vmem:[#allocation2 + $0xa8] sm:$0xff] %vm313_vm0, %v2451_v19  ;;  %336 = vst.msk [vmem:[#allocation2 + $0xb0] sm:$0xff] %vm313_vm0, %v2451_v19  ;;  %v2336_v23 = vld [vmem:[%s2524_s7 + $0x114] ss:$8 sps:$4 sm:$0xff]   ;;  %v2339_v25 = vld [vmem:[%s2524_s7 + $0x110] ss:$8 sps:$4 sm:$0xff]  }
  0x15   : > { %962 = vmatprep.subr.bf16.mxu0 %v2450_v1  ;;  %2258 = vmatprep.subr.bf16.mxu1 %v2450_v1  ;;  %337 = vst.msk [vmem:[#allocation2 + $0xb8] sm:$0xff] %vm313_vm0, %v2451_v19  ;;  %338 = vst.msk [vmem:[#allocation2 + $0xc0] sm:$0xff] %vm313_vm0, %v2451_v19  ;;  %v2340_v26 = vld [vmem:[%s2524_s7 + $0x24] ss:$8 sps:$4 sm:$0xff]   ;;  %v2344_v28 = vld [vmem:[%s2524_s7 + $0x20] ss:$8 sps:$4 sm:$0xff]  }
  0x16   : > { %339 = vst.msk [vmem:[#allocation2 + $0xc8] sm:$0xff] %vm313_vm0, %v2451_v19  ;;  %340 = vst.msk [vmem:[#allocation2 + $0xd0] sm:$0xff] %vm313_vm0, %v2451_v19  ;;  %v2342_v27 = vld [vmem:[%s2524_s7 + $0x124] ss:$8 sps:$4 sm:$0xff]   ;;  %v2345_v29 = vld [vmem:[%s2524_s7 + $0x120] ss:$8 sps:$4 sm:$0xff]  }
  0x17   : > { %341 = vst.msk [vmem:[#allocation2 + $0xd8] sm:$0xff] %vm313_vm0, %v2451_v19  ;;  %342 = vst.msk [vmem:[#allocation2 + $0xe0] sm:$0xff] %vm313_vm0, %v2451_v19  ;;  %v2346_v30 = vld [vmem:[%s2524_s7 + $0x34] ss:$8 sps:$4 sm:$0xff]   ;;  %v2350_v32 = vld [vmem:[%s2524_s7 + $0x30] ss:$8 sps:$4 sm:$0xff]  }
  0x18   : > { %963 = vmatpush1.bf16.msra.mxu0 %v2316_v5  ;;  %2274 = vmatpush1.bf16.msra.mxu1 %v2316_v5  ;;  %343 = vst.msk [vmem:[#allocation2 + $0xe8] sm:$0xff] %vm313_vm0, %v2451_v19  ;;  %344 = vst.msk [vmem:[#allocation2 + $0xf0] sm:$0xff] %vm313_vm0, %v2451_v19  ;;  %v2348_v31 = vld [vmem:[%s2524_s7 + $0x134] ss:$8 sps:$4 sm:$0xff]   ;;  %v2351_v33 = vld [vmem:[%s2524_s7 + $0x130] ss:$8 sps:$4 sm:$0xff]  }
  0x19   : > { %964 = vmatprep.subr.bf16.mxu0 %v2450_v1  ;;  %2259 = vmatprep.subr.bf16.mxu1 %v2450_v1  ;;  %345 = vst.msk [vmem:[#allocation2 + $0xf8] sm:$0xff] %vm313_vm0, %v2451_v19  ;;  %346 = vst.msk [vmem:[#allocation2 + $0x100] sm:$0xff] %vm313_vm0, %v2451_v19  ;;  %v2352_v34 = vld [vmem:[%s2524_s7 + $0x44] ss:$8 sps:$4 sm:$0xff]   ;;  %v2356_v36 = vld [vmem:[%s2524_s7 + $0x40] ss:$8 sps:$4 sm:$0xff]  }
  0x1a   : > { %347 = vst.msk [vmem:[#allocation2 + $0x108] sm:$0xff] %vm313_vm0, %v2451_v19  ;;  %348 = vst.msk [vmem:[#allocation2 + $0x110] sm:$0xff] %vm313_vm0, %v2451_v19  ;;  %v2354_v35 = vld [vmem:[%s2524_s7 + $0x144] ss:$8 sps:$4 sm:$0xff]   ;;  %v2357_v37 = vld [vmem:[%s2524_s7 + $0x140] ss:$8 sps:$4 sm:$0xff]  }
  0x1b   : > { %349 = vst.msk [vmem:[#allocation2 + $0x118] sm:$0xff] %vm313_vm0, %v2451_v19  ;;  %350 = vst.msk [vmem:[#allocation2 + $0x120] sm:$0xff] %vm313_vm0, %v2451_v19  ;;  %v2358_v38 = vld [vmem:[%s2524_s7 + $0x54] ss:$8 sps:$4 sm:$0xff]   ;;  %v2362_v40 = vld [vmem:[%s2524_s7 + $0x50] ss:$8 sps:$4 sm:$0xff]  }
  0x1c   : > { %965 = vmatpush1.bf16.msra.mxu0 %v2317_v7  ;;  %2275 = vmatpush1.bf16.msra.mxu1 %v2317_v7  ;;  %351 = vst.msk [vmem:[#allocation2 + $0x128] sm:$0xff] %vm313_vm0, %v2451_v19  ;;  %352 = vst.msk [vmem:[#allocation2 + $0x130] sm:$0xff] %vm313_vm0, %v2451_v19  ;;  %v2360_v39 = vld [vmem:[%s2524_s7 + $0x154] ss:$8 sps:$4 sm:$0xff]   ;;  %v2363_v41 = vld [vmem:[%s2524_s7 + $0x150] ss:$8 sps:$4 sm:$0xff]  }
  0x1d   : > { %966 = vmatprep.subr.bf16.mxu0 %v2450_v1  ;;  %2260 = vmatprep.subr.bf16.mxu1 %v2450_v1  ;;  %353 = vst.msk [vmem:[#allocation2 + $0x138] sm:$0xff] %vm313_vm0, %v2451_v19  ;;  %354 = vst.msk [vmem:[#allocation2 + $0x140] sm:$0xff] %vm313_vm0, %v2451_v19  ;;  %v2364_v42 = vld [vmem:[%s2524_s7 + $0x64] ss:$8 sps:$4 sm:$0xff]   ;;  %v2368_v44 = vld [vmem:[%s2524_s7 + $0x60] ss:$8 sps:$4 sm:$0xff]  }
  0x1e   : > { %355 = vst.msk [vmem:[#allocation2 + $0x148] sm:$0xff] %vm313_vm0, %v2451_v19  ;;  %356 = vst.msk [vmem:[#allocation2 + $0x150] sm:$0xff] %vm313_vm0, %v2451_v19  ;;  %v2366_v43 = vld [vmem:[%s2524_s7 + $0x164] ss:$8 sps:$4 sm:$0xff]   ;;  %v2369_v45 = vld [vmem:[%s2524_s7 + $0x160] ss:$8 sps:$4 sm:$0xff]  }
  0x1f   : > { %357 = vst.msk [vmem:[#allocation2 + $0x158] sm:$0xff] %vm313_vm0, %v2451_v19  ;;  %358 = vst.msk [vmem:[#allocation2 + $0x160] sm:$0xff] %vm313_vm0, %v2451_v19  ;;  %v2370_v46 = vld [vmem:[%s2524_s7 + $0x74] ss:$8 sps:$4 sm:$0xff]   ;;  %v2374_v48 = vld [vmem:[%s2524_s7 + $0x70] ss:$8 sps:$4 sm:$0xff]  }
  0x20   : > { %967 = vmatpush1.bf16.msra.mxu0 %v2318_v9  ;;  %2276 = vmatpush1.bf16.msra.mxu1 %v2318_v9  ;;  %359 = vst.msk [vmem:[#allocation2 + $0x168] sm:$0xff] %vm313_vm0, %v2451_v19  ;;  %360 = vst.msk [vmem:[#allocation2 + $0x170] sm:$0xff] %vm313_vm0, %v2451_v19  ;;  %v2372_v47 = vld [vmem:[%s2524_s7 + $0x174] ss:$8 sps:$4 sm:$0xff]   ;;  %v2375_v49 = vld [vmem:[%s2524_s7 + $0x170] ss:$8 sps:$4 sm:$0xff]  }
  0x21   : > { %968 = vmatprep.subr.bf16.mxu0 %v2450_v1  ;;  %2261 = vmatprep.subr.bf16.mxu1 %v2450_v1  ;;  %361 = vst.msk [vmem:[#allocation2 + $0x178] sm:$0xff] %vm313_vm0, %v2451_v19  ;;  %362 = vst.msk [vmem:[#allocation2 + $0x180] sm:$0xff] %vm313_vm0, %v2451_v19  ;;  %v2376_v50 = vld [vmem:[%s2524_s7 + $0x84] ss:$8 sps:$4 sm:$0xff]   ;;  %v2380_v52 = vld [vmem:[%s2524_s7 + $0x80] ss:$8 sps:$4 sm:$0xff]  }
  0x22   : > { %363 = vst.msk [vmem:[#allocation2 + $0x188] sm:$0xff] %vm313_vm0, %v2451_v19  ;;  %364 = vst.msk [vmem:[#allocation2 + $0x190] sm:$0xff] %vm313_vm0, %v2451_v19  ;;  %v2378_v51 = vld [vmem:[%s2524_s7 + $0x184] ss:$8 sps:$4 sm:$0xff]   ;;  %v2381_v53 = vld [vmem:[%s2524_s7 + $0x180] ss:$8 sps:$4 sm:$0xff]  }
  0x23   : > { %365 = vst.msk [vmem:[#allocation2 + $0x198] sm:$0xff] %vm313_vm0, %v2451_v19  ;;  %366 = vst.msk [vmem:[#allocation2 + $0x1a0] sm:$0xff] %vm313_vm0, %v2451_v19  ;;  %v2382_v54 = vld [vmem:[%s2524_s7 + $0x94] ss:$8 sps:$4 sm:$0xff]   ;;  %v2386_v56 = vld [vmem:[%s2524_s7 + $0x90] ss:$8 sps:$4 sm:$0xff]  }
  0x24   : > { %969 = vmatpush1.bf16.msra.mxu0 %v2319_v10  ;;  %2277 = vmatpush1.bf16.msra.mxu1 %v2319_v10  ;;  %367 = vst.msk [vmem:[#allocation2 + $0x1a8] sm:$0xff] %vm313_vm0, %v2451_v19  ;;  %368 = vst.msk [vmem:[#allocation2 + $0x1b0] sm:$0xff] %vm313_vm0, %v2451_v19  ;;  %v2384_v55 = vld [vmem:[%s2524_s7 + $0x194] ss:$8 sps:$4 sm:$0xff]   ;;  %v2387_v57 = vld [vmem:[%s2524_s7 + $0x190] ss:$8 sps:$4 sm:$0xff]  }
  0x25   : > { %970 = vmatprep.subr.bf16.mxu0 %v2450_v1  ;;  %2262 = vmatprep.subr.bf16.mxu1 %v2450_v1  ;;  %369 = vst.msk [vmem:[#allocation2 + $0x1b8] sm:$0xff] %vm313_vm0, %v2451_v19  ;;  %370 = vst.msk [vmem:[#allocation2 + $0x1c0] sm:$0xff] %vm313_vm0, %v2451_v19  ;;  %v2388_v58 = vld [vmem:[%s2524_s7 + $0xa4] ss:$8 sps:$4 sm:$0xff]   ;;  %v2392_v60 = vld [vmem:[%s2524_s7 + $0xa0] ss:$8 sps:$4 sm:$0xff]  }
  0x26   : > { %371 = vst.msk [vmem:[#allocation2 + $0x1c8] sm:$0xff] %vm313_vm0, %v2451_v19  ;;  %372 = vst.msk [vmem:[#allocation2 + $0x1d0] sm:$0xff] %vm313_vm0, %v2451_v19  ;;  %v2390_v59 = vld [vmem:[%s2524_s7 + $0x1a4] ss:$8 sps:$4 sm:$0xff]   ;;  %v2393_v61 = vld [vmem:[%s2524_s7 + $0x1a0] ss:$8 sps:$4 sm:$0xff]  }
  0x27   : > { %373 = vst.msk [vmem:[#allocation2 + $0x1d8] sm:$0xff] %vm313_vm0, %v2451_v19  ;;  %374 = vst.msk [vmem:[#allocation2 + $0x1e0] sm:$0xff] %vm313_vm0, %v2451_v19  ;;  %v2394_v62 = vld [vmem:[%s2524_s7 + $0xb4] ss:$8 sps:$4 sm:$0xff]   ;;  %v2398_v0 = vld [vmem:[%s2524_s7 + $0xb0] ss:$8 sps:$4 sm:$0xff]  }
  0x28   : > { %971 = vmatpush1.bf16.msra.mxu0 %v2320_v11  ;;  %2278 = vmatpush1.bf16.msra.mxu1 %v2320_v11  ;;  %375 = vst.msk [vmem:[#allocation2 + $0x1e8] sm:$0xff] %vm313_vm0, %v2451_v19  ;;  %376 = vst.msk [vmem:[#allocation2 + $0x1f0] sm:$0xff] %vm313_vm0, %v2451_v19  ;;  %v2396_v63 = vld [vmem:[%s2524_s7 + $0x1b4] ss:$8 sps:$4 sm:$0xff]   ;;  %v2400_v2 = vld [vmem:[%s2524_s7 + $0xc4] ss:$8 sps:$4 sm:$0xff]  }
  0x29   : > { %972 = vmatprep.subr.bf16.mxu0 %v2450_v1  ;;  %2263 = vmatprep.subr.bf16.mxu1 %v2450_v1  ;;  %377 = vst.msk [vmem:[#allocation2 + $0x1f8] sm:$0xff] %vm313_vm0, %v2451_v19  ;;  %v2402_v3 = vld [vmem:[%s2524_s7 + $0x1c4] ss:$8 sps:$4 sm:$0xff]   ;;  %v2404_v4 = vld [vmem:[%s2524_s7 + $0xc0] ss:$8 sps:$4 sm:$0xff]  }
  0x2a   : > { %v2405_v5 = vld [vmem:[%s2524_s7 + $0x1c0] ss:$8 sps:$4 sm:$0xff]   ;;  %v2406_v6 = vld [vmem:[%s2524_s7 + $0xd4] ss:$8 sps:$4 sm:$0xff]   ;;  %v2410_v8 = vld [vmem:[%s2524_s7 + $0xd0] ss:$8 sps:$4 sm:$0xff]  }
  0x2b   : > { %v2408_v7 = vld [vmem:[%s2524_s7 + $0x1d4] ss:$8 sps:$4 sm:$0xff]   ;;  %v2411_v9 = vld [vmem:[%s2524_s7 + $0x1d0] ss:$8 sps:$4 sm:$0xff]   ;;  %v2412_v10 = vld [vmem:[%s2524_s7 + $0xe4] ss:$8 sps:$4 sm:$0xff]  }
  0x2c   : > { %973 = vmatpush1.bf16.msra.mxu0 %v2321_v12  ;;  %2279 = vmatpush1.bf16.msra.mxu1 %v2321_v12  ;;  %v2414_v11 = vld [vmem:[%s2524_s7 + $0x1e4] ss:$8 sps:$4 sm:$0xff]   ;;  %v2416_v12 = vld [vmem:[%s2524_s7 + $0xe0] ss:$8 sps:$4 sm:$0xff]  }
  0x2d   : > { %974 = vmatprep.subr.bf16.mxu0 %v2450_v1  ;;  %2264 = vmatprep.subr.bf16.mxu1 %v2450_v1  ;;  %v410_v19 = vld [vmem:[#allocation2 + $0x100] sm:$0xff] }
  0x30   : > { %975 = vmatpush1.bf16.msra.mxu0 %v2322_v13  ;;  %2280 = vmatpush1.bf16.msra.mxu1 %v2322_v13  ;;  %v2417_v13 = vld [vmem:[%s2524_s7 + $0x1e0] ss:$8 sps:$4 sm:$0xff]  }
  0x31   : > { %976 = vmatprep.subr.bf16.mxu0 %v2450_v1  ;;  %2265 = vmatprep.subr.bf16.mxu1 %v2450_v1 }
  0x34   : > { %977 = vmatpush1.bf16.msra.mxu0 %v2323_v14  ;;  %2281 = vmatpush1.bf16.msra.mxu1 %v2323_v14  ;;  %v2418_v14 = vld [vmem:[%s2524_s7 + $0xf4] ss:$8 sps:$4 sm:$0xff]  }
  0x35   : > { %978 = vmatprep.subr.bf16.mxu0 %v2450_v1  ;;  %2266 = vmatprep.subr.bf16.mxu1 %v2450_v1 }
  0x38   : > { %979 = vmatpush1.bf16.msra.mxu0 %v2324_v15  ;;  %2282 = vmatpush1.bf16.msra.mxu1 %v2324_v15  ;;  %v2420_v15 = vld [vmem:[%s2524_s7 + $0x1f4] ss:$8 sps:$4 sm:$0xff]  }
  0x39   : > { %980 = vmatprep.subr.bf16.mxu0 %v2450_v1  ;;  %2267 = vmatprep.subr.bf16.mxu1 %v2450_v1 }
  0x3c   : > { %981 = vmatpush1.bf16.msra.mxu0 %v2325_v16  ;;  %2283 = vmatpush1.bf16.msra.mxu1 %v2325_v16  ;;  %v2422_v16 = vld [vmem:[%s2524_s7 + $0xf0] ss:$8 sps:$4 sm:$0xff]  }
  0x3d   : > { %982 = vmatprep.subr.bf16.mxu0 %v2450_v1  ;;  %2268 = vmatprep.subr.bf16.mxu1 %v2450_v1 }
  0x40   : > { %983 = vmatpush1.bf16.msra.mxu0 %v2326_v17  ;;  %2284 = vmatpush1.bf16.msra.mxu1 %v2326_v17  ;;  %v2423_v17 = vld [vmem:[%s2524_s7 + $0x1f0] ss:$8 sps:$4 sm:$0xff]  }
  0x41   : > { %984 = vmatprep.subr.bf16.mxu0 %v2450_v1  ;;  %2269 = vmatprep.subr.bf16.mxu1 %v2450_v1  ;;  %v2399_v1 = vld [vmem:[%s2524_s7 + $0x1b0] ss:$8 sps:$4 sm:$0xff]  }
  0x44   : > { %985 = vmatpush1.bf16.msra.mxu0 %v2583_v18  ;;  %2285 = vmatpush1.bf16.msra.mxu1 %v2583_v18  ;;  %v378_v18 = vld [vmem:[#allocation2] sm:$0xff] }
  0x47   : > { %987 = vmatmul.mubr.bf16.vlgmr.msra.gmra.mrb[0].mxu0 %v2328_v20  ;;  %1115 = vmatmul.mubr.bf16.vlgmr.msra.gmra.mrb[0].mxu1 %v2331_v21 }
  0x48   : > { %994 = vmatprep.mubr.bf16.mxu0 %v2334_v22  ;;  %1122 = vmatprep.mubr.bf16.mxu1 %v2336_v23  ;;  %v379_v22 = vld [vmem:[#allocation2 + $0x8] sm:$0xff] }
  0x49   : > { %v411_v23 = vld [vmem:[#allocation2 + $0x108] sm:$0xff] }
  0x4f   : > { %995 = vmatmul.mubr.bf16.gmra.mrb[4].mxu0 %v2338_v24  ;;  %1123 = vmatmul.mubr.bf16.gmra.mrb[4].mxu1 %v2339_v25 }
  0x50   : > { %1002 = vmatprep.mubr.bf16.mxu0 %v2340_v26  ;;  %1130 = vmatprep.mubr.bf16.mxu1 %v2342_v27 }
  0x57   : > { %1003 = vmatmul.mubr.bf16.gmra.mrb[8].mxu0 %v2344_v28  ;;  %1131 = vmatmul.mubr.bf16.gmra.mrb[8].mxu1 %v2345_v29 }
  0x58   : > { %1010 = vmatprep.mubr.bf16.mxu0 %v2346_v30  ;;  %1138 = vmatprep.mubr.bf16.mxu1 %v2348_v31 }
  0x5f   : > { %1011 = vmatmul.mubr.bf16.gmra.mrb[12].mxu0 %v2350_v32  ;;  %1139 = vmatmul.mubr.bf16.gmra.mrb[12].mxu1 %v2351_v33 }
  0x60   : > { %1018 = vmatprep.mubr.bf16.mxu0 %v2352_v34  ;;  %1146 = vmatprep.mubr.bf16.mxu1 %v2354_v35  ;;  %v380_v34 = vld [vmem:[#allocation2 + $0x10] sm:$0xff] }
  0x61   : > { %v412_v35 = vld [vmem:[#allocation2 + $0x110] sm:$0xff] }
  0x67   : > { %1019 = vmatmul.mubr.bf16.gmra.mrb[16].mxu0 %v2356_v36  ;;  %1147 = vmatmul.mubr.bf16.gmra.mrb[16].mxu1 %v2357_v37  ;;  %v2786_v36 = vld [vmem:[%s3136_s2] ss:$0 sm:$0xff] }
  0x68   : > { %1026 = vmatprep.mubr.bf16.mxu0 %v2358_v38  ;;  %1154 = vmatprep.mubr.bf16.mxu1 %v2360_v39  ;;  %v381_v39 = vld [vmem:[#allocation2 + $0x18] sm:$0xff] }
  0x6f   : > { %1027 = vmatmul.mubr.bf16.gmra.mrb[20].mxu0 %v2362_v40  ;;  %1155 = vmatmul.mubr.bf16.gmra.mrb[20].mxu1 %v2363_v41  ;;  %v413_v40 = vld [vmem:[#allocation2 + $0x118] sm:$0xff] }
  0x70   : > { %1034 = vmatprep.mubr.bf16.mxu0 %v2364_v42  ;;  %1162 = vmatprep.mubr.bf16.mxu1 %v2366_v43 }
  0x77   : > { %1035 = vmatmul.mubr.bf16.gmra.mrb[24].mxu0 %v2368_v44  ;;  %1163 = vmatmul.mubr.bf16.gmra.mrb[24].mxu1 %v2369_v45 }
  0x78   : > { %1042 = vmatprep.mubr.bf16.mxu0 %v2370_v46  ;;  %1170 = vmatprep.mubr.bf16.mxu1 %v2372_v47  ;;  %v2791_v46 = vld [vmem:[%s3137_s3] ss:$0 sm:$0xff] }
  0x7f   : > { %1043 = vmatmul.mubr.bf16.gmra.mrb[28].mxu0 %v2374_v48  ;;  %1171 = vmatmul.mubr.bf16.gmra.mrb[28].mxu1 %v2375_v49 }
  0x80   : > { %1050 = vmatprep.mubr.bf16.mxu0 %v2376_v50  ;;  %1178 = vmatprep.mubr.bf16.mxu1 %v2378_v51 }
  0x87   : > { %1051 = vmatmul.mubr.bf16.gmra.mrb[32].mxu0 %v2380_v52  ;;  %1179 = vmatmul.mubr.bf16.gmra.mrb[32].mxu1 %v2381_v53 }
  0x88   : > { %1058 = vmatprep.mubr.bf16.mxu0 %v2382_v54  ;;  %1186 = vmatprep.mubr.bf16.mxu1 %v2384_v55 }
  0x8f   : > { %1059 = vmatmul.mubr.bf16.gmra.mrb[36].mxu0 %v2386_v56  ;;  %1187 = vmatmul.mubr.bf16.gmra.mrb[36].mxu1 %v2387_v57 }
  0x90   : > { %1066 = vmatprep.mubr.bf16.mxu0 %v2388_v58  ;;  %1194 = vmatprep.mubr.bf16.mxu1 %v2390_v59 }
  0x97   : > { %1067 = vmatmul.mubr.bf16.gmra.mrb[40].mxu0 %v2392_v60  ;;  %1195 = vmatmul.mubr.bf16.gmra.mrb[40].mxu1 %v2393_v61 }
  0x98   : > { %1074 = vmatprep.mubr.bf16.mxu0 %v2394_v62  ;;  %1202 = vmatprep.mubr.bf16.mxu1 %v2396_v63  ;;  %v382_v62 = vld [vmem:[#allocation2 + $0x20] sm:$0xff] }
  0x99   : > { %v414_v63 = vld [vmem:[#allocation2 + $0x120] sm:$0xff] }
  0x9f   : > { %1075 = vmatmul.mubr.bf16.gmra.mrb[44].mxu0 %v2398_v0  ;;  %1203 = vmatmul.mubr.bf16.gmra.mrb[44].mxu1 %v2399_v1 }
  0xa0   : > { %1082 = vmatprep.mubr.bf16.mxu0 %v2400_v2  ;;  %1210 = vmatprep.mubr.bf16.mxu1 %v2402_v3 }
  0xa7   : > { %1083 = vmatmul.mubr.bf16.gmra.mrb[48].mxu0 %v2404_v4  ;;  %1211 = vmatmul.mubr.bf16.gmra.mrb[48].mxu1 %v2405_v5 }
  0xa8   : > { %1090 = vmatprep.mubr.bf16.mxu0 %v2406_v6  ;;  %1218 = vmatprep.mubr.bf16.mxu1 %v2408_v7  ;;  %v383_v6 = vld [vmem:[#allocation2 + $0x28] sm:$0xff] }
  0xa9   : > { %v415_v7 = vld [vmem:[#allocation2 + $0x128] sm:$0xff] }
  0xaf   : > { %1091 = vmatmul.mubr.bf16.gmra.mrb[52].mxu0 %v2410_v8  ;;  %1219 = vmatmul.mubr.bf16.gmra.mrb[52].mxu1 %v2411_v9 }
  0xb0   : > { %1098 = vmatprep.mubr.bf16.mxu0 %v2412_v10  ;;  %1226 = vmatprep.mubr.bf16.mxu1 %v2414_v11 }
  0xb7   : > { %1099 = vmatmul.mubr.bf16.gmra.mrb[56].mxu0 %v2416_v12  ;;  %1227 = vmatmul.mubr.bf16.gmra.mrb[56].mxu1 %v2417_v13 }
  0xb8   : > { %1106 = vmatprep.mubr.bf16.mxu0 %v2418_v14  ;;  %1234 = vmatprep.mubr.bf16.mxu1 %v2420_v15 }
  0xbf   : > { %1107 = vmatmul.mubr.bf16.gmra.mrb[60].mxu0 %v2422_v16  ;;  %1235 = vmatmul.mubr.bf16.gmra.mrb[60].mxu1 %v2423_v17 }
 0x11a   : > { %v988_v20 = vpop.f32.mrb[0].mxu0  ;;  %v1116_v21 = vpop.f32.mrb[0].mxu1 }
 0x11b   : > { %v1243_v24 = vadd.f32 %v988_v20, %v378_v18  ;;  %v1275_v25 = vadd.f32 %v1116_v21, %v410_v19  ;;  %v990_v26 = vpop.f32.mrb[1].mxu0  ;;  %v1118_v27 = vpop.f32.mrb[1].mxu1 }
 0x11c   : > { %v991_v28 = vpop.f32.mrb[2].mxu0  ;;  %v1119_v29 = vpop.f32.mrb[2].mxu1 }
 0x11d   : > { %1308 = vst.msk [vmem:[#allocation2] sm:$0xff] %vm313_vm0, %v1243_v24  ;;  %1340 = vst.msk [vmem:[#allocation2 + $0x100] sm:$0xff] %vm313_vm0, %v1275_v25  ;;  %v1244_v30 = vadd.f32 %v991_v28, %v379_v22  ;;  %v1276_v31 = vadd.f32 %v1119_v29, %v411_v23  ;;  %v993_v32 = vpop.f32.mrb[3].mxu0  ;;  %v1121_v33 = vpop.f32.mrb[3].mxu1 }
 0x11f   : > { %1309 = vst.msk [vmem:[#allocation2 + $0x8] sm:$0xff] %vm313_vm0, %v1244_v30  ;;  %1341 = vst.msk [vmem:[#allocation2 + $0x108] sm:$0xff] %vm313_vm0, %v1276_v31  ;;  %v384_v30 = vld [vmem:[#allocation2 + $0x30] sm:$0xff] }
 0x120   : > { %v416_v31 = vld [vmem:[#allocation2 + $0x130] sm:$0xff] }
 0x122   : > { %v996_v37 = vpop.f32.mrb[4].mxu0  ;;  %v1124_v38 = vpop.f32.mrb[4].mxu1 }
 0x123   : > { %v1245_v41 = vadd.f32 %v996_v37, %v380_v34  ;;  %v1277_v42 = vadd.f32 %v1124_v38, %v412_v35  ;;  %v998_v43 = vpop.f32.mrb[5].mxu0  ;;  %v1126_v44 = vpop.f32.mrb[5].mxu1 }
 0x124   : > { %v1375_v45 = vld [vmem:[#allocation2] sm:$0xff]  ;;  %v999_v48 = vpop.f32.mrb[6].mxu0  ;;  %v1127_v49 = vpop.f32.mrb[6].mxu1 }
 0x125   : > { %v1407_v47 = vld [vmem:[#allocation2 + $0x100] sm:$0xff]  ;;  %v1446_v50 = vmul.f32 %v2786_v36, %v1375_v45  ;;  %1310 = vst.msk [vmem:[#allocation2 + $0x10] sm:$0xff] %vm313_vm0, %v1245_v41  ;;  %1342 = vst.msk [vmem:[#allocation2 + $0x110] sm:$0xff] %vm313_vm0, %v1277_v42  ;;  %v1246_v52 = vadd.f32 %v999_v48, %v381_v39  ;;  %v1278_v53 = vadd.f32 %v1127_v49, %v413_v40  ;;  %v1001_v54 = vpop.f32.mrb[7].mxu0  ;;  %v1129_v55 = vpop.f32.mrb[7].mxu1  ;;  %v385_v39 = vld [vmem:[#allocation2 + $0x38] sm:$0xff] }
 0x126   : > { %v1478_v51 = vmul.f32 %v2786_v36, %v1407_v47  ;;  %v1376_v56 = vld [vmem:[#allocation2 + $0x8] sm:$0xff]  ;;  %v417_v40 = vld [vmem:[#allocation2 + $0x138] sm:$0xff] }
 0x127   : > { %v1408_v57 = vld [vmem:[#allocation2 + $0x108] sm:$0xff]  ;;  %v1517_v58 = vadd.f32 %v2791_v46, %v1446_v50  ;;  %v1447_v60 = vmul.f32 %v2786_v36, %v1376_v56  ;;  %1311 = vst.msk [vmem:[#allocation2 + $0x18] sm:$0xff] %vm313_vm0, %v1246_v52  ;;  %1343 = vst.msk [vmem:[#allocation2 + $0x118] sm:$0xff] %vm313_vm0, %v1278_v53 }
 0x128   : > { %v1549_v59 = vadd.f32 %v2791_v46, %v1478_v51  ;;  %v1479_v61 = vmul.f32 %v2786_v36, %v1408_v57 }
 0x129   : > { %v2190_v0 = vpack.c.bf16 %v1517_v58, %v1517_v58  ;;  %v1518_v2 = vadd.f32 %v2791_v46, %v1447_v60 }
 0x12a   : > { %v2222_v1 = vpack.c.bf16 %v1549_v59, %v1549_v59  ;;  %v1550_v3 = vadd.f32 %v2791_v46, %v1479_v61  ;;  %v1004_v4 = vpop.f32.mrb[8].mxu0  ;;  %v1132_v5 = vpop.f32.mrb[8].mxu1 }
 0x12b   : > { %1838 = vst.msk [vmem:[%s2807_s14] sm:$0xf] %vm1837_vm1, %v2190_v0  ;;  %v2191_v8 = vpack.c.bf16 %v1518_v2, %v1518_v2  ;;  %v1247_v10 = vadd.f32 %v1004_v4, %v382_v62  ;;  %v1279_v11 = vadd.f32 %v1132_v5, %v414_v63  ;;  %v1006_v12 = vpop.f32.mrb[9].mxu0  ;;  %v1134_v13 = vpop.f32.mrb[9].mxu1  ;;  %v386_v0 = vld [vmem:[#allocation2 + $0x40] sm:$0xff] }
 0x12c   : > { %1870 = vst.msk [vmem:[%s2807_s14 + $0x80] sm:$0xf] %vm1837_vm1, %v2222_v1  ;;  %v2223_v9 = vpack.c.bf16 %v1550_v3, %v1550_v3  ;;  %v1377_v14 = vld [vmem:[#allocation2 + $0x10] sm:$0xff]  ;;  %v1007_v16 = vpop.f32.mrb[10].mxu0  ;;  %v1135_v17 = vpop.f32.mrb[10].mxu1  ;;  %v418_v1 = vld [vmem:[#allocation2 + $0x140] sm:$0xff] }
 0x12d   : > { %v1409_v15 = vld [vmem:[#allocation2 + $0x110] sm:$0xff]  ;;  %1839 = vst.msk [vmem:[%s2807_s14 + $0x4] sm:$0xf] %vm1837_vm1, %v2191_v8  ;;  %v1448_v18 = vmul.f32 %v2786_v36, %v1377_v14  ;;  %v1248_v20 = vadd.f32 %v1007_v16, %v383_v6  ;;  %v1280_v21 = vadd.f32 %v1135_v17, %v415_v7  ;;  %v1009_v22 = vpop.f32.mrb[11].mxu0  ;;  %v1137_v23 = vpop.f32.mrb[11].mxu1  ;;  %v387_v8 = vld [vmem:[#allocation2 + $0x48] sm:$0xff] }
 0x12e   : > { %1871 = vst.msk [vmem:[%s2807_s14 + $0x84] sm:$0xf] %vm1837_vm1, %v2223_v9  ;;  %v1480_v19 = vmul.f32 %v2786_v36, %v1409_v15  ;;  %v1378_v24 = vld [vmem:[#allocation2 + $0x18] sm:$0xff]  ;;  %v419_v9 = vld [vmem:[#allocation2 + $0x148] sm:$0xff] }
 0x12f   : > { %1312 = vst.msk [vmem:[#allocation2 + $0x20] sm:$0xff] %vm313_vm0, %v1247_v10  ;;  %1344 = vst.msk [vmem:[#allocation2 + $0x120] sm:$0xff] %vm313_vm0, %v1279_v11  ;;  %v1410_v25 = vld [vmem:[#allocation2 + $0x118] sm:$0xff]  ;;  %v1519_v26 = vadd.f32 %v2791_v46, %v1448_v18  ;;  %v1449_v28 = vmul.f32 %v2786_v36, %v1378_v24 }
 0x130   : > { %v1551_v27 = vadd.f32 %v2791_v46, %v1480_v19  ;;  %v1481_v29 = vmul.f32 %v2786_v36, %v1410_v25  ;;  %1313 = vst.msk [vmem:[#allocation2 + $0x28] sm:$0xff] %vm313_vm0, %v1248_v20  ;;  %1345 = vst.msk [vmem:[#allocation2 + $0x128] sm:$0xff] %vm313_vm0, %v1280_v21 }
 0x131   : > { %v2192_v32 = vpack.c.bf16 %v1519_v26, %v1519_v26  ;;  %v1520_v34 = vadd.f32 %v2791_v46, %v1449_v28 }
 0x132   : > { %v2224_v33 = vpack.c.bf16 %v1551_v27, %v1551_v27  ;;  %v1552_v35 = vadd.f32 %v2791_v46, %v1481_v29  ;;  %v1012_v37 = vpop.f32.mrb[12].mxu0  ;;  %v1140_v38 = vpop.f32.mrb[12].mxu1 }
 0x133   : > { %1840 = vst.msk [vmem:[%s2807_s14 + $0x8] sm:$0xf] %vm1837_vm1, %v2192_v32  ;;  %v2193_v41 = vpack.c.bf16 %v1520_v34, %v1520_v34  ;;  %v1249_v43 = vadd.f32 %v1012_v37, %v384_v30  ;;  %v1281_v44 = vadd.f32 %v1140_v38, %v416_v31  ;;  %v1014_v45 = vpop.f32.mrb[13].mxu0  ;;  %v1142_v47 = vpop.f32.mrb[13].mxu1  ;;  %v388_v32 = vld [vmem:[#allocation2 + $0x50] sm:$0xff] }
 0x134   : > { %1872 = vst.msk [vmem:[%s2807_s14 + $0x88] sm:$0xf] %vm1837_vm1, %v2224_v33  ;;  %v2225_v42 = vpack.c.bf16 %v1552_v35, %v1552_v35  ;;  %v1015_v50 = vpop.f32.mrb[14].mxu0  ;;  %v1143_v51 = vpop.f32.mrb[14].mxu1  ;;  %v420_v33 = vld [vmem:[#allocation2 + $0x150] sm:$0xff] }
 0x135   : > { %1841 = vst.msk [vmem:[%s2807_s14 + $0xc] sm:$0xf] %vm1837_vm1, %v2193_v41  ;;  %v1250_v54 = vadd.f32 %v1015_v50, %v385_v39  ;;  %v1282_v55 = vadd.f32 %v1143_v51, %v417_v40  ;;  %v1017_v56 = vpop.f32.mrb[15].mxu0  ;;  %v1145_v57 = vpop.f32.mrb[15].mxu1  ;;  %v389_v41 = vld [vmem:[#allocation2 + $0x58] sm:$0xff] }
 0x136   : > { %v1379_v48 = vld [vmem:[#allocation2 + $0x20] sm:$0xff]  ;;  %1873 = vst.msk [vmem:[%s2807_s14 + $0x8c] sm:$0xf] %vm1837_vm1, %v2225_v42  ;;  %v421_v42 = vld [vmem:[#allocation2 + $0x158] sm:$0xff] }
 0x137   : > { %v1411_v49 = vld [vmem:[#allocation2 + $0x120] sm:$0xff]  ;;  %v1450_v52 = vmul.f32 %v2786_v36, %v1379_v48  ;;  %1314 = vst.msk [vmem:[#allocation2 + $0x30] sm:$0xff] %vm313_vm0, %v1249_v43  ;;  %1346 = vst.msk [vmem:[#allocation2 + $0x130] sm:$0xff] %vm313_vm0, %v1281_v44  ;;  %v1380_v58 = vld [vmem:[#allocation2 + $0x28] sm:$0xff] }
 0x138   : > { %v1482_v53 = vmul.f32 %v2786_v36, %v1411_v49  ;;  %v1412_v59 = vld [vmem:[#allocation2 + $0x128] sm:$0xff]  ;;  %v1451_v62 = vmul.f32 %v2786_v36, %v1380_v58  ;;  %1315 = vst.msk [vmem:[#allocation2 + $0x38] sm:$0xff] %vm313_vm0, %v1250_v54  ;;  %1347 = vst.msk [vmem:[#allocation2 + $0x138] sm:$0xff] %vm313_vm0, %v1282_v55 }
 0x139   : > { %v1521_v60 = vadd.f32 %v2791_v46, %v1450_v52  ;;  %v1483_v63 = vmul.f32 %v2786_v36, %v1412_v59 }
 0x13a   : > { %v1553_v61 = vadd.f32 %v2791_v46, %v1482_v53  ;;  %v1522_v4 = vadd.f32 %v2791_v46, %v1451_v62  ;;  %v1020_v6 = vpop.f32.mrb[16].mxu0  ;;  %v1148_v7 = vpop.f32.mrb[16].mxu1 }
 0x13b   : > { %v2194_v2 = vpack.c.bf16 %v1521_v60, %v1521_v60  ;;  %v1554_v5 = vadd.f32 %v2791_v46, %v1483_v63  ;;  %v1251_v12 = vadd.f32 %v1020_v6, %v386_v0  ;;  %v1283_v13 = vadd.f32 %v1148_v7, %v418_v1  ;;  %v1022_v14 = vpop.f32.mrb[17].mxu0  ;;  %v1150_v15 = vpop.f32.mrb[17].mxu1 }
 0x13c   : > { %v2226_v3 = vpack.c.bf16 %v1553_v61, %v1553_v61  ;;  %v2195_v10 = vpack.c.bf16 %v1522_v4, %v1522_v4  ;;  %v1023_v18 = vpop.f32.mrb[18].mxu0  ;;  %v1151_v19 = vpop.f32.mrb[18].mxu1 }
 0x13d   : > { %1842 = vst.msk [vmem:[%s2807_s14 + $0x10] sm:$0xf] %vm1837_vm1, %v2194_v2  ;;  %v2227_v11 = vpack.c.bf16 %v1554_v5, %v1554_v5  ;;  %v1252_v22 = vadd.f32 %v1023_v18, %v387_v8  ;;  %v1284_v23 = vadd.f32 %v1151_v19, %v419_v9  ;;  %v1025_v24 = vpop.f32.mrb[19].mxu0  ;;  %v1153_v25 = vpop.f32.mrb[19].mxu1  ;;  %v390_v2 = vld [vmem:[#allocation2 + $0x60] sm:$0xff] }
 0x13e   : > { %1874 = vst.msk [vmem:[%s2807_s14 + $0x90] sm:$0xf] %vm1837_vm1, %v2226_v3  ;;  %v1381_v16 = vld [vmem:[#allocation2 + $0x30] sm:$0xff]  ;;  %1843 = vst.msk [vmem:[%s2807_s14 + $0x14] sm:$0xf] %vm1837_vm1, %v2195_v10  ;;  %v422_v3 = vld [vmem:[#allocation2 + $0x160] sm:$0xff] }
 0x13f   : > { %v1413_v17 = vld [vmem:[#allocation2 + $0x130] sm:$0xff]  ;;  %1875 = vst.msk [vmem:[%s2807_s14 + $0x94] sm:$0xf] %vm1837_vm1, %v2227_v11  ;;  %v1452_v20 = vmul.f32 %v2786_v36, %v1381_v16  ;;  %v1382_v26 = vld [vmem:[#allocation2 + $0x38] sm:$0xff]  ;;  %v391_v10 = vld [vmem:[#allocation2 + $0x68] sm:$0xff] }
 0x140   : > { %v1484_v21 = vmul.f32 %v2786_v36, %v1413_v17  ;;  %1316 = vst.msk [vmem:[#allocation2 + $0x40] sm:$0xff] %vm313_vm0, %v1251_v12  ;;  %1348 = vst.msk [vmem:[#allocation2 + $0x140] sm:$0xff] %vm313_vm0, %v1283_v13  ;;  %v1414_v27 = vld [vmem:[#allocation2 + $0x138] sm:$0xff]  ;;  %v1453_v30 = vmul.f32 %v2786_v36, %v1382_v26  ;;  %v423_v11 = vld [vmem:[#allocation2 + $0x168] sm:$0xff] }
 0x141   : > { %v1523_v28 = vadd.f32 %v2791_v46, %v1452_v20  ;;  %v1485_v31 = vmul.f32 %v2786_v36, %v1414_v27  ;;  %1317 = vst.msk [vmem:[#allocation2 + $0x48] sm:$0xff] %vm313_vm0, %v1252_v22  ;;  %1349 = vst.msk [vmem:[#allocation2 + $0x148] sm:$0xff] %vm313_vm0, %v1284_v23 }
 0x142   : > { %v1555_v29 = vadd.f32 %v2791_v46, %v1484_v21  ;;  %v1524_v37 = vadd.f32 %v2791_v46, %v1453_v30  ;;  %v1028_v39 = vpop.f32.mrb[20].mxu0  ;;  %v1156_v40 = vpop.f32.mrb[20].mxu1 }
 0x143   : > { %v2196_v34 = vpack.c.bf16 %v1523_v28, %v1523_v28  ;;  %v1556_v38 = vadd.f32 %v2791_v46, %v1485_v31  ;;  %v1253_v45 = vadd.f32 %v1028_v39, %v388_v32  ;;  %v1285_v47 = vadd.f32 %v1156_v40, %v420_v33  ;;  %v1030_v48 = vpop.f32.mrb[21].mxu0  ;;  %v1158_v49 = vpop.f32.mrb[21].mxu1 }
 0x144   : > { %v2228_v35 = vpack.c.bf16 %v1555_v29, %v1555_v29  ;;  %v2197_v43 = vpack.c.bf16 %v1524_v37, %v1524_v37  ;;  %v1031_v52 = vpop.f32.mrb[22].mxu0  ;;  %v1159_v53 = vpop.f32.mrb[22].mxu1 }
 0x145   : > { %1844 = vst.msk [vmem:[%s2807_s14 + $0x18] sm:$0xf] %vm1837_vm1, %v2196_v34  ;;  %v2229_v44 = vpack.c.bf16 %v1556_v38, %v1556_v38  ;;  %v1254_v56 = vadd.f32 %v1031_v52, %v389_v41  ;;  %v1286_v57 = vadd.f32 %v1159_v53, %v421_v42  ;;  %v1033_v58 = vpop.f32.mrb[23].mxu0  ;;  %v1161_v59 = vpop.f32.mrb[23].mxu1  ;;  %v392_v34 = vld [vmem:[#allocation2 + $0x70] sm:$0xff] }
 0x146   : > { %1876 = vst.msk [vmem:[%s2807_s14 + $0x98] sm:$0xf] %vm1837_vm1, %v2228_v35  ;;  %1845 = vst.msk [vmem:[%s2807_s14 + $0x1c] sm:$0xf] %vm1837_vm1, %v2197_v43  ;;  %v424_v35 = vld [vmem:[#allocation2 + $0x170] sm:$0xff]  ;;  %v393_v43 = vld [vmem:[#allocation2 + $0x78] sm:$0xff] }
 0x147   : > { %v1383_v50 = vld [vmem:[#allocation2 + $0x40] sm:$0xff]  ;;  %1877 = vst.msk [vmem:[%s2807_s14 + $0x9c] sm:$0xf] %vm1837_vm1, %v2229_v44  ;;  %v425_v44 = vld [vmem:[#allocation2 + $0x178] sm:$0xff] }
 0x148   : > { %v1415_v51 = vld [vmem:[#allocation2 + $0x140] sm:$0xff]  ;;  %v1454_v54 = vmul.f32 %v2786_v36, %v1383_v50  ;;  %1318 = vst.msk [vmem:[#allocation2 + $0x50] sm:$0xff] %vm313_vm0, %v1253_v45  ;;  %1350 = vst.msk [vmem:[#allocation2 + $0x150] sm:$0xff] %vm313_vm0, %v1285_v47  ;;  %v1384_v60 = vld [vmem:[#allocation2 + $0x48] sm:$0xff] }
 0x149   : > { %v1486_v55 = vmul.f32 %v2786_v36, %v1415_v51  ;;  %v1416_v61 = vld [vmem:[#allocation2 + $0x148] sm:$0xff]  ;;  %v1455_v0 = vmul.f32 %v2786_v36, %v1384_v60  ;;  %1319 = vst.msk [vmem:[#allocation2 + $0x58] sm:$0xff] %vm313_vm0, %v1254_v56  ;;  %1351 = vst.msk [vmem:[#allocation2 + $0x158] sm:$0xff] %vm313_vm0, %v1286_v57 }
 0x14a   : > { %v1525_v62 = vadd.f32 %v2791_v46, %v1454_v54  ;;  %v1487_v1 = vmul.f32 %v2786_v36, %v1416_v61  ;;  %v1036_v8 = vpop.f32.mrb[24].mxu0  ;;  %v1164_v9 = vpop.f32.mrb[24].mxu1 }
 0x14b   : > { %v1557_v63 = vadd.f32 %v2791_v46, %v1486_v55  ;;  %v1526_v6 = vadd.f32 %v2791_v46, %v1455_v0  ;;  %v1255_v14 = vadd.f32 %v1036_v8, %v390_v2  ;;  %v1287_v15 = vadd.f32 %v1164_v9, %v422_v3  ;;  %v1038_v16 = vpop.f32.mrb[25].mxu0  ;;  %v1166_v17 = vpop.f32.mrb[25].mxu1 }
 0x14c   : > { %v2198_v4 = vpack.c.bf16 %v1525_v62, %v1525_v62  ;;  %v1558_v7 = vadd.f32 %v2791_v46, %v1487_v1  ;;  %v1039_v20 = vpop.f32.mrb[26].mxu0  ;;  %v1167_v21 = vpop.f32.mrb[26].mxu1 }
 0x14d   : > { %v2230_v5 = vpack.c.bf16 %v1557_v63, %v1557_v63  ;;  %v2199_v12 = vpack.c.bf16 %v1526_v6, %v1526_v6  ;;  %1320 = vst.msk [vmem:[#allocation2 + $0x60] sm:$0xff] %vm313_vm0, %v1255_v14  ;;  %1352 = vst.msk [vmem:[#allocation2 + $0x160] sm:$0xff] %vm313_vm0, %v1287_v15  ;;  %v1256_v24 = vadd.f32 %v1039_v20, %v391_v10  ;;  %v1041_v26 = vpop.f32.mrb[27].mxu0  ;;  %v1169_v27 = vpop.f32.mrb[27].mxu1 }
 0x14e   : > { %1846 = vst.msk [vmem:[%s2807_s14 + $0x20] sm:$0xf] %vm1837_vm1, %v2198_v4  ;;  %v2231_v13 = vpack.c.bf16 %v1558_v7, %v1558_v7  ;;  %v1288_v25 = vadd.f32 %v1167_v21, %v423_v11  ;;  %v394_v4 = vld [vmem:[#allocation2 + $0x80] sm:$0xff] }
 0x14f   : > { %1878 = vst.msk [vmem:[%s2807_s14 + $0xa0] sm:$0xf] %vm1837_vm1, %v2230_v5  ;;  %v1385_v18 = vld [vmem:[#allocation2 + $0x50] sm:$0xff]  ;;  %1847 = vst.msk [vmem:[%s2807_s14 + $0x24] sm:$0xf] %vm1837_vm1, %v2199_v12  ;;  %v426_v5 = vld [vmem:[#allocation2 + $0x180] sm:$0xff] }
 0x150   : > { %v1417_v19 = vld [vmem:[#allocation2 + $0x150] sm:$0xff]  ;;  %1879 = vst.msk [vmem:[%s2807_s14 + $0xa4] sm:$0xf] %vm1837_vm1, %v2231_v13  ;;  %v1456_v22 = vmul.f32 %v2786_v36, %v1385_v18  ;;  %v1386_v28 = vld [vmem:[#allocation2 + $0x58] sm:$0xff]  ;;  %v395_v12 = vld [vmem:[#allocation2 + $0x88] sm:$0xff] }
 0x151   : > { %v1488_v23 = vmul.f32 %v2786_v36, %v1417_v19  ;;  %v1418_v29 = vld [vmem:[#allocation2 + $0x158] sm:$0xff]  ;;  %v1457_v32 = vmul.f32 %v2786_v36, %v1386_v28  ;;  %1321 = vst.msk [vmem:[#allocation2 + $0x68] sm:$0xff] %vm313_vm0, %v1256_v24  ;;  %1353 = vst.msk [vmem:[#allocation2 + $0x168] sm:$0xff] %vm313_vm0, %v1288_v25  ;;  %v427_v13 = vld [vmem:[#allocation2 + $0x188] sm:$0xff] }
 0x152   : > { %v1527_v30 = vadd.f32 %v2791_v46, %v1456_v22  ;;  %v1489_v33 = vmul.f32 %v2786_v36, %v1418_v29  ;;  %v1044_v41 = vpop.f32.mrb[28].mxu0  ;;  %v1172_v42 = vpop.f32.mrb[28].mxu1 }
 0x153   : > { %v1559_v31 = vadd.f32 %v2791_v46, %v1488_v23  ;;  %v1528_v39 = vadd.f32 %v2791_v46, %v1457_v32  ;;  %v1257_v48 = vadd.f32 %v1044_v41, %v392_v34  ;;  %v1289_v49 = vadd.f32 %v1172_v42, %v424_v35  ;;  %v1046_v50 = vpop.f32.mrb[29].mxu0  ;;  %v1174_v51 = vpop.f32.mrb[29].mxu1 }
 0x154   : > { %v2200_v37 = vpack.c.bf16 %v1527_v30, %v1527_v30  ;;  %v1560_v40 = vadd.f32 %v2791_v46, %v1489_v33  ;;  %v1387_v52 = vld [vmem:[#allocation2 + $0x60] sm:$0xff]  ;;  %v1047_v54 = vpop.f32.mrb[30].mxu0  ;;  %v1175_v55 = vpop.f32.mrb[30].mxu1 }
 0x155   : > { %v2232_v38 = vpack.c.bf16 %v1559_v31, %v1559_v31  ;;  %v2201_v45 = vpack.c.bf16 %v1528_v39, %v1528_v39  ;;  %v1419_v53 = vld [vmem:[#allocation2 + $0x160] sm:$0xff]  ;;  %v1458_v56 = vmul.f32 %v2786_v36, %v1387_v52  ;;  %1322 = vst.msk [vmem:[#allocation2 + $0x70] sm:$0xff] %vm313_vm0, %v1257_v48  ;;  %1354 = vst.msk [vmem:[#allocation2 + $0x170] sm:$0xff] %vm313_vm0, %v1289_v49  ;;  %v1049_v60 = vpop.f32.mrb[31].mxu0  ;;  %v1177_v61 = vpop.f32.mrb[31].mxu1 }
 0x156   : > { %1848 = vst.msk [vmem:[%s2807_s14 + $0x28] sm:$0xf] %vm1837_vm1, %v2200_v37  ;;  %v2233_v47 = vpack.c.bf16 %v1560_v40, %v1560_v40  ;;  %v1490_v57 = vmul.f32 %v2786_v36, %v1419_v53  ;;  %v1258_v58 = vadd.f32 %v1047_v54, %v393_v43  ;;  %v1290_v59 = vadd.f32 %v1175_v55, %v425_v44  ;;  %v396_v37 = vld [vmem:[#allocation2 + $0x90] sm:$0xff] }
 0x157   : > { %1880 = vst.msk [vmem:[%s2807_s14 + $0xa8] sm:$0xf] %vm1837_vm1, %v2232_v38  ;;  %1849 = vst.msk [vmem:[%s2807_s14 + $0x2c] sm:$0xf] %vm1837_vm1, %v2201_v45  ;;  %v1529_v0 = vadd.f32 %v2791_v46, %v1458_v56  ;;  %v428_v38 = vld [vmem:[#allocation2 + $0x190] sm:$0xff]  ;;  %v397_v45 = vld [vmem:[#allocation2 + $0x98] sm:$0xff] }
 0x158   : > { %1881 = vst.msk [vmem:[%s2807_s14 + $0xac] sm:$0xf] %vm1837_vm1, %v2233_v47  ;;  %v1388_v62 = vld [vmem:[#allocation2 + $0x68] sm:$0xff]  ;;  %v1561_v1 = vadd.f32 %v2791_v46, %v1490_v57  ;;  %v429_v47 = vld [vmem:[#allocation2 + $0x198] sm:$0xff] }
 0x159   : > { %v1420_v63 = vld [vmem:[#allocation2 + $0x168] sm:$0xff]  ;;  %v1459_v2 = vmul.f32 %v2786_v36, %v1388_v62  ;;  %1323 = vst.msk [vmem:[#allocation2 + $0x78] sm:$0xff] %vm313_vm0, %v1258_v58  ;;  %1355 = vst.msk [vmem:[#allocation2 + $0x178] sm:$0xff] %vm313_vm0, %v1290_v59  ;;  %v2202_v6 = vpack.c.bf16 %v1529_v0, %v1529_v0 }
 0x15a   : > { %v1491_v3 = vmul.f32 %v2786_v36, %v1420_v63  ;;  %v2234_v7 = vpack.c.bf16 %v1561_v1, %v1561_v1  ;;  %v1052_v10 = vpop.f32.mrb[32].mxu0  ;;  %v1180_v11 = vpop.f32.mrb[32].mxu1 }
 0x15b   : > { %v1530_v8 = vadd.f32 %v2791_v46, %v1459_v2  ;;  %1850 = vst.msk [vmem:[%s2807_s14 + $0x30] sm:$0xf] %vm1837_vm1, %v2202_v6  ;;  %v1259_v16 = vadd.f32 %v1052_v10, %v394_v4  ;;  %v1291_v17 = vadd.f32 %v1180_v11, %v426_v5  ;;  %v1054_v18 = vpop.f32.mrb[33].mxu0  ;;  %v1182_v19 = vpop.f32.mrb[33].mxu1  ;;  %v398_v6 = vld [vmem:[#allocation2 + $0xa0] sm:$0xff] }
 0x15c   : > { %v1562_v9 = vadd.f32 %v2791_v46, %v1491_v3  ;;  %1882 = vst.msk [vmem:[%s2807_s14 + $0xb0] sm:$0xf] %vm1837_vm1, %v2234_v7  ;;  %v1389_v20 = vld [vmem:[#allocation2 + $0x70] sm:$0xff]  ;;  %v1055_v22 = vpop.f32.mrb[34].mxu0  ;;  %v1183_v23 = vpop.f32.mrb[34].mxu1  ;;  %v430_v7 = vld [vmem:[#allocation2 + $0x1a0] sm:$0xff] }
 0x15d   : > { %v2203_v14 = vpack.c.bf16 %v1530_v8, %v1530_v8  ;;  %v1421_v21 = vld [vmem:[#allocation2 + $0x170] sm:$0xff]  ;;  %v1460_v24 = vmul.f32 %v2786_v36, %v1389_v20  ;;  %1324 = vst.msk [vmem:[#allocation2 + $0x80] sm:$0xff] %vm313_vm0, %v1259_v16  ;;  %1356 = vst.msk [vmem:[#allocation2 + $0x180] sm:$0xff] %vm313_vm0, %v1291_v17  ;;  %v1260_v26 = vadd.f32 %v1055_v22, %v395_v12  ;;  %v1057_v28 = vpop.f32.mrb[35].mxu0  ;;  %v1185_v29 = vpop.f32.mrb[35].mxu1 }
 0x15e   : > { %v2235_v15 = vpack.c.bf16 %v1562_v9, %v1562_v9  ;;  %v1492_v25 = vmul.f32 %v2786_v36, %v1421_v21  ;;  %v1292_v27 = vadd.f32 %v1183_v23, %v427_v13 }
 0x15f   : > { %1851 = vst.msk [vmem:[%s2807_s14 + $0x34] sm:$0xf] %vm1837_vm1, %v2203_v14  ;;  %v1531_v32 = vadd.f32 %v2791_v46, %v1460_v24  ;;  %v399_v14 = vld [vmem:[#allocation2 + $0xa8] sm:$0xff] }
 0x160   : > { %1883 = vst.msk [vmem:[%s2807_s14 + $0xb4] sm:$0xf] %vm1837_vm1, %v2235_v15  ;;  %v1390_v30 = vld [vmem:[#allocation2 + $0x78] sm:$0xff]  ;;  %v1563_v33 = vadd.f32 %v2791_v46, %v1492_v25  ;;  %v431_v15 = vld [vmem:[#allocation2 + $0x1a8] sm:$0xff] }
 0x161   : > { %v1422_v31 = vld [vmem:[#allocation2 + $0x178] sm:$0xff]  ;;  %v1461_v34 = vmul.f32 %v2786_v36, %v1390_v30  ;;  %1325 = vst.msk [vmem:[#allocation2 + $0x88] sm:$0xff] %vm313_vm0, %v1260_v26  ;;  %1357 = vst.msk [vmem:[#allocation2 + $0x188] sm:$0xff] %vm313_vm0, %v1292_v27  ;;  %v2204_v39 = vpack.c.bf16 %v1531_v32, %v1531_v32 }
 0x162   : > { %v1493_v35 = vmul.f32 %v2786_v36, %v1422_v31  ;;  %v2236_v40 = vpack.c.bf16 %v1563_v33, %v1563_v33  ;;  %v1060_v43 = vpop.f32.mrb[36].mxu0  ;;  %v1188_v44 = vpop.f32.mrb[36].mxu1 }
 0x163   : > { %v1532_v41 = vadd.f32 %v2791_v46, %v1461_v34  ;;  %1852 = vst.msk [vmem:[%s2807_s14 + $0x38] sm:$0xf] %vm1837_vm1, %v2204_v39  ;;  %v1261_v50 = vadd.f32 %v1060_v43, %v396_v37  ;;  %v1293_v51 = vadd.f32 %v1188_v44, %v428_v38  ;;  %v1062_v52 = vpop.f32.mrb[37].mxu0  ;;  %v1190_v53 = vpop.f32.mrb[37].mxu1  ;;  %v400_v39 = vld [vmem:[#allocation2 + $0xb0] sm:$0xff] }
 0x164   : > { %v1564_v42 = vadd.f32 %v2791_v46, %v1493_v35  ;;  %1884 = vst.msk [vmem:[%s2807_s14 + $0xb8] sm:$0xf] %vm1837_vm1, %v2236_v40  ;;  %v1391_v54 = vld [vmem:[#allocation2 + $0x80] sm:$0xff]  ;;  %v1063_v56 = vpop.f32.mrb[38].mxu0  ;;  %v1191_v57 = vpop.f32.mrb[38].mxu1  ;;  %v432_v40 = vld [vmem:[#allocation2 + $0x1b0] sm:$0xff] }
 0x165   : > { %v2205_v48 = vpack.c.bf16 %v1532_v41, %v1532_v41  ;;  %v1423_v55 = vld [vmem:[#allocation2 + $0x180] sm:$0xff]  ;;  %v1462_v58 = vmul.f32 %v2786_v36, %v1391_v54  ;;  %1326 = vst.msk [vmem:[#allocation2 + $0x90] sm:$0xff] %vm313_vm0, %v1261_v50  ;;  %1358 = vst.msk [vmem:[#allocation2 + $0x190] sm:$0xff] %vm313_vm0, %v1293_v51  ;;  %v1262_v60 = vadd.f32 %v1063_v56, %v397_v45  ;;  %v1065_v62 = vpop.f32.mrb[39].mxu0  ;;  %v1193_v63 = vpop.f32.mrb[39].mxu1 }
 0x166   : > { %v2237_v49 = vpack.c.bf16 %v1564_v42, %v1564_v42  ;;  %v1494_v59 = vmul.f32 %v2786_v36, %v1423_v55  ;;  %v1294_v61 = vadd.f32 %v1191_v57, %v429_v47 }
 0x167   : > { %1853 = vst.msk [vmem:[%s2807_s14 + $0x3c] sm:$0xf] %vm1837_vm1, %v2205_v48  ;;  %v1533_v2 = vadd.f32 %v2791_v46, %v1462_v58  ;;  %v401_v48 = vld [vmem:[#allocation2 + $0xb8] sm:$0xff] }
 0x168   : > { %1885 = vst.msk [vmem:[%s2807_s14 + $0xbc] sm:$0xf] %vm1837_vm1, %v2237_v49  ;;  %v1392_v0 = vld [vmem:[#allocation2 + $0x88] sm:$0xff]  ;;  %v1565_v3 = vadd.f32 %v2791_v46, %v1494_v59  ;;  %v433_v49 = vld [vmem:[#allocation2 + $0x1b8] sm:$0xff] }
 0x169   : > { %v1424_v1 = vld [vmem:[#allocation2 + $0x188] sm:$0xff]  ;;  %v1463_v4 = vmul.f32 %v2786_v36, %v1392_v0  ;;  %1327 = vst.msk [vmem:[#allocation2 + $0x98] sm:$0xff] %vm313_vm0, %v1262_v60  ;;  %1359 = vst.msk [vmem:[#allocation2 + $0x198] sm:$0xff] %vm313_vm0, %v1294_v61  ;;  %v2206_v8 = vpack.c.bf16 %v1533_v2, %v1533_v2 }
 0x16a   : > { %v1495_v5 = vmul.f32 %v2786_v36, %v1424_v1  ;;  %v2238_v9 = vpack.c.bf16 %v1565_v3, %v1565_v3  ;;  %v1068_v12 = vpop.f32.mrb[40].mxu0  ;;  %v1196_v13 = vpop.f32.mrb[40].mxu1 }
 0x16b   : > { %v1534_v10 = vadd.f32 %v2791_v46, %v1463_v4  ;;  %1854 = vst.msk [vmem:[%s2807_s14 + $0x40] sm:$0xf] %vm1837_vm1, %v2206_v8  ;;  %v1263_v18 = vadd.f32 %v1068_v12, %v398_v6  ;;  %v1295_v19 = vadd.f32 %v1196_v13, %v430_v7  ;;  %v1070_v20 = vpop.f32.mrb[41].mxu0  ;;  %v1198_v21 = vpop.f32.mrb[41].mxu1  ;;  %v402_v8 = vld [vmem:[#allocation2 + $0xc0] sm:$0xff] }
 0x16c   : > { %v1566_v11 = vadd.f32 %v2791_v46, %v1495_v5  ;;  %1886 = vst.msk [vmem:[%s2807_s14 + $0xc0] sm:$0xf] %vm1837_vm1, %v2238_v9  ;;  %v1393_v22 = vld [vmem:[#allocation2 + $0x90] sm:$0xff]  ;;  %v1071_v24 = vpop.f32.mrb[42].mxu0  ;;  %v1199_v25 = vpop.f32.mrb[42].mxu1  ;;  %v434_v9 = vld [vmem:[#allocation2 + $0x1c0] sm:$0xff] }
 0x16d   : > { %v2207_v16 = vpack.c.bf16 %v1534_v10, %v1534_v10  ;;  %v1425_v23 = vld [vmem:[#allocation2 + $0x190] sm:$0xff]  ;;  %v1464_v26 = vmul.f32 %v2786_v36, %v1393_v22  ;;  %1328 = vst.msk [vmem:[#allocation2 + $0xa0] sm:$0xff] %vm313_vm0, %v1263_v18  ;;  %1360 = vst.msk [vmem:[#allocation2 + $0x1a0] sm:$0xff] %vm313_vm0, %v1295_v19  ;;  %v1264_v28 = vadd.f32 %v1071_v24, %v399_v14  ;;  %v1073_v30 = vpop.f32.mrb[43].mxu0  ;;  %v1201_v31 = vpop.f32.mrb[43].mxu1 }
 0x16e   : > { %v2239_v17 = vpack.c.bf16 %v1566_v11, %v1566_v11  ;;  %v1496_v27 = vmul.f32 %v2786_v36, %v1425_v23  ;;  %v1296_v29 = vadd.f32 %v1199_v25, %v431_v15 }
 0x16f   : > { %1855 = vst.msk [vmem:[%s2807_s14 + $0x44] sm:$0xf] %vm1837_vm1, %v2207_v16  ;;  %v1535_v34 = vadd.f32 %v2791_v46, %v1464_v26  ;;  %v403_v16 = vld [vmem:[#allocation2 + $0xc8] sm:$0xff] }
 0x170   : > { %1887 = vst.msk [vmem:[%s2807_s14 + $0xc4] sm:$0xf] %vm1837_vm1, %v2239_v17  ;;  %v1394_v32 = vld [vmem:[#allocation2 + $0x98] sm:$0xff]  ;;  %v1567_v35 = vadd.f32 %v2791_v46, %v1496_v27  ;;  %v435_v17 = vld [vmem:[#allocation2 + $0x1c8] sm:$0xff] }
 0x171   : > { %v1426_v33 = vld [vmem:[#allocation2 + $0x198] sm:$0xff]  ;;  %v1465_v37 = vmul.f32 %v2786_v36, %v1394_v32  ;;  %1329 = vst.msk [vmem:[#allocation2 + $0xa8] sm:$0xff] %vm313_vm0, %v1264_v28  ;;  %1361 = vst.msk [vmem:[#allocation2 + $0x1a8] sm:$0xff] %vm313_vm0, %v1296_v29  ;;  %v2208_v41 = vpack.c.bf16 %v1535_v34, %v1535_v34 }
 0x172   : > { %v1497_v38 = vmul.f32 %v2786_v36, %v1426_v33  ;;  %v2240_v42 = vpack.c.bf16 %v1567_v35, %v1567_v35  ;;  %v1076_v45 = vpop.f32.mrb[44].mxu0  ;;  %v1204_v47 = vpop.f32.mrb[44].mxu1 }
 0x173   : > { %v1536_v43 = vadd.f32 %v2791_v46, %v1465_v37  ;;  %1856 = vst.msk [vmem:[%s2807_s14 + $0x48] sm:$0xf] %vm1837_vm1, %v2208_v41  ;;  %v1265_v52 = vadd.f32 %v1076_v45, %v400_v39  ;;  %v1297_v53 = vadd.f32 %v1204_v47, %v432_v40  ;;  %v1078_v54 = vpop.f32.mrb[45].mxu0  ;;  %v1206_v55 = vpop.f32.mrb[45].mxu1  ;;  %v404_v41 = vld [vmem:[#allocation2 + $0xd0] sm:$0xff] }
 0x174   : > { %v1568_v44 = vadd.f32 %v2791_v46, %v1497_v38  ;;  %1888 = vst.msk [vmem:[%s2807_s14 + $0xc8] sm:$0xf] %vm1837_vm1, %v2240_v42  ;;  %v1395_v56 = vld [vmem:[#allocation2 + $0xa0] sm:$0xff]  ;;  %v1079_v58 = vpop.f32.mrb[46].mxu0  ;;  %v1207_v59 = vpop.f32.mrb[46].mxu1  ;;  %v436_v42 = vld [vmem:[#allocation2 + $0x1d0] sm:$0xff] }
 0x175   : > { %v2209_v50 = vpack.c.bf16 %v1536_v43, %v1536_v43  ;;  %v1427_v57 = vld [vmem:[#allocation2 + $0x1a0] sm:$0xff]  ;;  %v1466_v60 = vmul.f32 %v2786_v36, %v1395_v56  ;;  %1330 = vst.msk [vmem:[#allocation2 + $0xb0] sm:$0xff] %vm313_vm0, %v1265_v52  ;;  %1362 = vst.msk [vmem:[#allocation2 + $0x1b0] sm:$0xff] %vm313_vm0, %v1297_v53  ;;  %v1266_v62 = vadd.f32 %v1079_v58, %v401_v48  ;;  %v1081_v0 = vpop.f32.mrb[47].mxu0  ;;  %v1209_v1 = vpop.f32.mrb[47].mxu1 }
 0x176   : > { %v2241_v51 = vpack.c.bf16 %v1568_v44, %v1568_v44  ;;  %v1498_v61 = vmul.f32 %v2786_v36, %v1427_v57  ;;  %v1298_v63 = vadd.f32 %v1207_v59, %v433_v49 }
 0x177   : > { %1857 = vst.msk [vmem:[%s2807_s14 + $0x4c] sm:$0xf] %vm1837_vm1, %v2209_v50  ;;  %v1537_v4 = vadd.f32 %v2791_v46, %v1466_v60  ;;  %v405_v50 = vld [vmem:[#allocation2 + $0xd8] sm:$0xff] }
 0x178   : > { %1889 = vst.msk [vmem:[%s2807_s14 + $0xcc] sm:$0xf] %vm1837_vm1, %v2241_v51  ;;  %v1396_v2 = vld [vmem:[#allocation2 + $0xa8] sm:$0xff]  ;;  %v1569_v5 = vadd.f32 %v2791_v46, %v1498_v61  ;;  %v437_v51 = vld [vmem:[#allocation2 + $0x1d8] sm:$0xff] }
 0x179   : > { %v1428_v3 = vld [vmem:[#allocation2 + $0x1a8] sm:$0xff]  ;;  %v1467_v6 = vmul.f32 %v2786_v36, %v1396_v2  ;;  %1331 = vst.msk [vmem:[#allocation2 + $0xb8] sm:$0xff] %vm313_vm0, %v1266_v62  ;;  %1363 = vst.msk [vmem:[#allocation2 + $0x1b8] sm:$0xff] %vm313_vm0, %v1298_v63  ;;  %v2210_v10 = vpack.c.bf16 %v1537_v4, %v1537_v4 }
 0x17a   : > { %v1499_v7 = vmul.f32 %v2786_v36, %v1428_v3  ;;  %v2242_v11 = vpack.c.bf16 %v1569_v5, %v1569_v5  ;;  %v1084_v14 = vpop.f32.mrb[48].mxu0  ;;  %v1212_v15 = vpop.f32.mrb[48].mxu1 }
 0x17b   : > { %v1538_v12 = vadd.f32 %v2791_v46, %v1467_v6  ;;  %1858 = vst.msk [vmem:[%s2807_s14 + $0x50] sm:$0xf] %vm1837_vm1, %v2210_v10  ;;  %v1267_v20 = vadd.f32 %v1084_v14, %v402_v8  ;;  %v1299_v21 = vadd.f32 %v1212_v15, %v434_v9  ;;  %v1086_v22 = vpop.f32.mrb[49].mxu0  ;;  %v1214_v23 = vpop.f32.mrb[49].mxu1  ;;  %v406_v10 = vld [vmem:[#allocation2 + $0xe0] sm:$0xff] }
 0x17c   : > { %v1570_v13 = vadd.f32 %v2791_v46, %v1499_v7  ;;  %1890 = vst.msk [vmem:[%s2807_s14 + $0xd0] sm:$0xf] %vm1837_vm1, %v2242_v11  ;;  %v1397_v24 = vld [vmem:[#allocation2 + $0xb0] sm:$0xff]  ;;  %v1087_v26 = vpop.f32.mrb[50].mxu0  ;;  %v1215_v27 = vpop.f32.mrb[50].mxu1  ;;  %v438_v11 = vld [vmem:[#allocation2 + $0x1e0] sm:$0xff] }
 0x17d   : > { %v2211_v18 = vpack.c.bf16 %v1538_v12, %v1538_v12  ;;  %v1429_v25 = vld [vmem:[#allocation2 + $0x1b0] sm:$0xff]  ;;  %v1468_v28 = vmul.f32 %v2786_v36, %v1397_v24  ;;  %1332 = vst.msk [vmem:[#allocation2 + $0xc0] sm:$0xff] %vm313_vm0, %v1267_v20  ;;  %1364 = vst.msk [vmem:[#allocation2 + $0x1c0] sm:$0xff] %vm313_vm0, %v1299_v21  ;;  %v1268_v30 = vadd.f32 %v1087_v26, %v403_v16  ;;  %v1089_v32 = vpop.f32.mrb[51].mxu0  ;;  %v1217_v33 = vpop.f32.mrb[51].mxu1 }
 0x17e   : > { %v2243_v19 = vpack.c.bf16 %v1570_v13, %v1570_v13  ;;  %v1500_v29 = vmul.f32 %v2786_v36, %v1429_v25  ;;  %v1300_v31 = vadd.f32 %v1215_v27, %v435_v17 }
 0x17f   : > { %1859 = vst.msk [vmem:[%s2807_s14 + $0x54] sm:$0xf] %vm1837_vm1, %v2211_v18  ;;  %v1539_v37 = vadd.f32 %v2791_v46, %v1468_v28  ;;  %v407_v18 = vld [vmem:[#allocation2 + $0xe8] sm:$0xff]  ;;  %v3062_v28 = vld [vmem:[%s3136_s2] ss:$0 sm:$0xff] }
 0x180   : > { %1891 = vst.msk [vmem:[%s2807_s14 + $0xd4] sm:$0xf] %vm1837_vm1, %v2243_v19  ;;  %v1398_v34 = vld [vmem:[#allocation2 + $0xb8] sm:$0xff]  ;;  %v1571_v38 = vadd.f32 %v2791_v46, %v1500_v29  ;;  %v439_v19 = vld [vmem:[#allocation2 + $0x1e8] sm:$0xff] }
 0x181   : > { %v1430_v35 = vld [vmem:[#allocation2 + $0x1b8] sm:$0xff]  ;;  %v1469_v39 = vmul.f32 %v2786_v36, %v1398_v34  ;;  %1333 = vst.msk [vmem:[#allocation2 + $0xc8] sm:$0xff] %vm313_vm0, %v1268_v30  ;;  %1365 = vst.msk [vmem:[#allocation2 + $0x1c8] sm:$0xff] %vm313_vm0, %v1300_v31  ;;  %v2212_v43 = vpack.c.bf16 %v1539_v37, %v1539_v37 }
 0x182   : > { %v1501_v40 = vmul.f32 %v2786_v36, %v1430_v35  ;;  %v2244_v44 = vpack.c.bf16 %v1571_v38, %v1571_v38  ;;  %v1092_v48 = vpop.f32.mrb[52].mxu0  ;;  %v1220_v49 = vpop.f32.mrb[52].mxu1  ;;  %v3071_v38 = vld [vmem:[%s3137_s3] ss:$0 sm:$0xff] }
 0x183   : > { %v1540_v45 = vadd.f32 %v2791_v46, %v1469_v39  ;;  %1860 = vst.msk [vmem:[%s2807_s14 + $0x58] sm:$0xf] %vm1837_vm1, %v2212_v43  ;;  %v1269_v54 = vadd.f32 %v1092_v48, %v404_v41  ;;  %v1301_v55 = vadd.f32 %v1220_v49, %v436_v42  ;;  %v1094_v56 = vpop.f32.mrb[53].mxu0  ;;  %v1222_v57 = vpop.f32.mrb[53].mxu1  ;;  %v408_v43 = vld [vmem:[#allocation2 + $0xf0] sm:$0xff] }
 0x184   : > { %v1572_v47 = vadd.f32 %v2791_v46, %v1501_v40  ;;  %1892 = vst.msk [vmem:[%s2807_s14 + $0xd8] sm:$0xf] %vm1837_vm1, %v2244_v44  ;;  %v1399_v58 = vld [vmem:[#allocation2 + $0xc0] sm:$0xff]  ;;  %v1095_v60 = vpop.f32.mrb[54].mxu0  ;;  %v1223_v61 = vpop.f32.mrb[54].mxu1  ;;  %v440_v44 = vld [vmem:[#allocation2 + $0x1f0] sm:$0xff] }
 0x185   : > { %v2213_v52 = vpack.c.bf16 %v1540_v45, %v1540_v45  ;;  %v1431_v59 = vld [vmem:[#allocation2 + $0x1c0] sm:$0xff]  ;;  %v1470_v62 = vmul.f32 %v2786_v36, %v1399_v58  ;;  %1334 = vst.msk [vmem:[#allocation2 + $0xd0] sm:$0xff] %vm313_vm0, %v1269_v54  ;;  %1366 = vst.msk [vmem:[#allocation2 + $0x1d0] sm:$0xff] %vm313_vm0, %v1301_v55  ;;  %v1270_v0 = vadd.f32 %v1095_v60, %v405_v50  ;;  %v1097_v2 = vpop.f32.mrb[55].mxu0  ;;  %v1225_v3 = vpop.f32.mrb[55].mxu1 }
 0x186   : > { %v2245_v53 = vpack.c.bf16 %v1572_v47, %v1572_v47  ;;  %v1502_v63 = vmul.f32 %v2786_v36, %v1431_v59  ;;  %v1302_v1 = vadd.f32 %v1223_v61, %v437_v51 }
 0x187   : > { %1861 = vst.msk [vmem:[%s2807_s14 + $0x5c] sm:$0xf] %vm1837_vm1, %v2213_v52  ;;  %v1541_v6 = vadd.f32 %v2791_v46, %v1470_v62  ;;  %v409_v52 = vld [vmem:[#allocation2 + $0xf8] sm:$0xff] }
 0x188   : > { %1893 = vst.msk [vmem:[%s2807_s14 + $0xdc] sm:$0xf] %vm1837_vm1, %v2245_v53  ;;  %v1400_v4 = vld [vmem:[#allocation2 + $0xc8] sm:$0xff]  ;;  %v1573_v7 = vadd.f32 %v2791_v46, %v1502_v63  ;;  %v441_v53 = vld [vmem:[#allocation2 + $0x1f8] sm:$0xff] }
 0x189   : > { %v1432_v5 = vld [vmem:[#allocation2 + $0x1c8] sm:$0xff]  ;;  %v1471_v8 = vmul.f32 %v2786_v36, %v1400_v4  ;;  %1335 = vst.msk [vmem:[#allocation2 + $0xd8] sm:$0xff] %vm313_vm0, %v1270_v0  ;;  %1367 = vst.msk [vmem:[#allocation2 + $0x1d8] sm:$0xff] %vm313_vm0, %v1302_v1  ;;  %v2214_v12 = vpack.c.bf16 %v1541_v6, %v1541_v6 }
 0x18a   : > { %v1503_v9 = vmul.f32 %v2786_v36, %v1432_v5  ;;  %v2246_v13 = vpack.c.bf16 %v1573_v7, %v1573_v7  ;;  %v1100_v16 = vpop.f32.mrb[56].mxu0  ;;  %v1228_v17 = vpop.f32.mrb[56].mxu1 }
 0x18b   : > { %v1542_v14 = vadd.f32 %v2791_v46, %v1471_v8  ;;  %1862 = vst.msk [vmem:[%s2807_s14 + $0x60] sm:$0xf] %vm1837_vm1, %v2214_v12  ;;  %v1271_v21 = vadd.f32 %v1100_v16, %v406_v10  ;;  %v1303_v22 = vadd.f32 %v1228_v17, %v438_v11  ;;  %v1102_v23 = vpop.f32.mrb[57].mxu0  ;;  %v1230_v24 = vpop.f32.mrb[57].mxu1 }
 0x18c   : > { %v1574_v15 = vadd.f32 %v2791_v46, %v1503_v9  ;;  %1894 = vst.msk [vmem:[%s2807_s14 + $0xe0] sm:$0xf] %vm1837_vm1, %v2246_v13  ;;  %v1401_v25 = vld [vmem:[#allocation2 + $0xd0] sm:$0xff]  ;;  %v1103_v27 = vpop.f32.mrb[58].mxu0  ;;  %v1231_v46 = vpop.f32.mrb[58].mxu1 }
 0x18d   : > { %v2215_v36 = vpack.c.bf16 %v1542_v14, %v1542_v14  ;;  %v1433_v26 = vld [vmem:[#allocation2 + $0x1d0] sm:$0xff]  ;;  %v1472_v29 = vmul.f32 %v3062_v28, %v1401_v25  ;;  %1336 = vst.msk [vmem:[#allocation2 + $0xe0] sm:$0xff] %vm313_vm0, %v1271_v21  ;;  %1368 = vst.msk [vmem:[#allocation2 + $0x1e0] sm:$0xff] %vm313_vm0, %v1303_v22  ;;  %v1272_v31 = vadd.f32 %v1103_v27, %v407_v18  ;;  %v1105_v33 = vpop.f32.mrb[59].mxu0  ;;  %v1233_v34 = vpop.f32.mrb[59].mxu1 }
 0x18e   : > { %v2247_v20 = vpack.c.bf16 %v1574_v15, %v1574_v15  ;;  %v1504_v30 = vmul.f32 %v3062_v28, %v1433_v26  ;;  %v1304_v32 = vadd.f32 %v1231_v46, %v439_v19 }
 0x18f   : > { %1863 = vst.msk [vmem:[%s2807_s14 + $0x64] sm:$0xf] %vm1837_vm1, %v2215_v36  ;;  %v1543_v39 = vadd.f32 %v3071_v38, %v1472_v29 }
 0x190   : > { %1895 = vst.msk [vmem:[%s2807_s14 + $0xe4] sm:$0xf] %vm1837_vm1, %v2247_v20  ;;  %v1402_v35 = vld [vmem:[#allocation2 + $0xd8] sm:$0xff]  ;;  %v1575_v40 = vadd.f32 %v3071_v38, %v1504_v30 }
 0x191   : > { %v1434_v37 = vld [vmem:[#allocation2 + $0x1d8] sm:$0xff]  ;;  %v1473_v41 = vmul.f32 %v3062_v28, %v1402_v35  ;;  %1337 = vst.msk [vmem:[#allocation2 + $0xe8] sm:$0xff] %vm313_vm0, %v1272_v31  ;;  %1369 = vst.msk [vmem:[#allocation2 + $0x1e8] sm:$0xff] %vm313_vm0, %v1304_v32  ;;  %v2216_v45 = vpack.c.bf16 %v1543_v39, %v1543_v39 }
 0x192   : > { %v1505_v42 = vmul.f32 %v3062_v28, %v1434_v37  ;;  %v2248_v47 = vpack.c.bf16 %v1575_v40, %v1575_v40  ;;  %v1108_v50 = vpop.f32.mrb[60].mxu0  ;;  %v1236_v51 = vpop.f32.mrb[60].mxu1 }
 0x193   : > { %v1544_v48 = vadd.f32 %v3071_v38, %v1473_v41  ;;  %1864 = vst.msk [vmem:[%s2807_s14 + $0x68] sm:$0xf] %vm1837_vm1, %v2216_v45  ;;  %v1273_v56 = vadd.f32 %v1108_v50, %v408_v43  ;;  %v1305_v57 = vadd.f32 %v1236_v51, %v440_v44  ;;  %v1110_v58 = vpop.f32.mrb[61].mxu0  ;;  %v1238_v59 = vpop.f32.mrb[61].mxu1 }
 0x194   : > { %v1576_v49 = vadd.f32 %v3071_v38, %v1505_v42  ;;  %1896 = vst.msk [vmem:[%s2807_s14 + $0xe8] sm:$0xf] %vm1837_vm1, %v2248_v47  ;;  %v1403_v60 = vld [vmem:[#allocation2 + $0xe0] sm:$0xff]  ;;  %v1111_v62 = vpop.f32.mrb[62].mxu0  ;;  %v1239_v63 = vpop.f32.mrb[62].mxu1 }
 0x195   : > { %v2217_v54 = vpack.c.bf16 %v1544_v48, %v1544_v48  ;;  %v1435_v61 = vld [vmem:[#allocation2 + $0x1e0] sm:$0xff]  ;;  %v1474_v0 = vmul.f32 %v3062_v28, %v1403_v60  ;;  %1338 = vst.msk [vmem:[#allocation2 + $0xf0] sm:$0xff] %vm313_vm0, %v1273_v56  ;;  %1370 = vst.msk [vmem:[#allocation2 + $0x1f0] sm:$0xff] %vm313_vm0, %v1305_v57  ;;  %v1274_v2 = vadd.f32 %v1111_v62, %v409_v52  ;;  %v1113_v4 = vpop.f32.mrb[63].mxu0  ;;  %v1241_v5 = vpop.f32.mrb[63].mxu1 }
 0x196   : > { %v2249_v55 = vpack.c.bf16 %v1576_v49, %v1576_v49  ;;  %v1506_v1 = vmul.f32 %v3062_v28, %v1435_v61  ;;  %v1306_v3 = vadd.f32 %v1239_v63, %v441_v53 }
 0x197   : > { %1865 = vst.msk [vmem:[%s2807_s14 + $0x6c] sm:$0xf] %vm1837_vm1, %v2217_v54  ;;  %v1545_v8 = vadd.f32 %v3071_v38, %v1474_v0 }
 0x198   : > { %1897 = vst.msk [vmem:[%s2807_s14 + $0xec] sm:$0xf] %vm1837_vm1, %v2249_v55  ;;  %v1404_v6 = vld [vmem:[#allocation2 + $0xe8] sm:$0xff]  ;;  %v1577_v9 = vadd.f32 %v3071_v38, %v1506_v1 }
 0x199   : > { %v1436_v7 = vld [vmem:[#allocation2 + $0x1e8] sm:$0xff]  ;;  %v1475_v10 = vmul.f32 %v3062_v28, %v1404_v6  ;;  %1339 = vst.msk [vmem:[#allocation2 + $0xf8] sm:$0xff] %vm313_vm0, %v1274_v2  ;;  %1371 = vst.msk [vmem:[#allocation2 + $0x1f8] sm:$0xff] %vm313_vm0, %v1306_v3  ;;  %v2218_v12 = vpack.c.bf16 %v1545_v8, %v1545_v8 }
 0x19a   : > { %v1507_v11 = vmul.f32 %v3062_v28, %v1436_v7  ;;  %v2250_v13 = vpack.c.bf16 %v1577_v9, %v1577_v9 }
 0x19b   : > { %v1546_v14 = vadd.f32 %v3071_v38, %v1475_v10  ;;  %1866 = vst.msk [vmem:[%s2807_s14 + $0x70] sm:$0xf] %vm1837_vm1, %v2218_v12 }
 0x19c   : > { %v1578_v15 = vadd.f32 %v3071_v38, %v1507_v11  ;;  %1898 = vst.msk [vmem:[%s2807_s14 + $0xf0] sm:$0xf] %vm1837_vm1, %v2250_v13  ;;  %v1405_v18 = vld [vmem:[#allocation2 + $0xf0] sm:$0xff] }
 0x19d   : > { %v2219_v16 = vpack.c.bf16 %v1546_v14, %v1546_v14  ;;  %v1437_v19 = vld [vmem:[#allocation2 + $0x1f0] sm:$0xff]  ;;  %v1476_v36 = vmul.f32 %v3062_v28, %v1405_v18 }
 0x19e   : > { %v2251_v17 = vpack.c.bf16 %v1578_v15, %v1578_v15  ;;  %v1508_v20 = vmul.f32 %v3062_v28, %v1437_v19 }
 0x19f   : > { %1867 = vst.msk [vmem:[%s2807_s14 + $0x74] sm:$0xf] %vm1837_vm1, %v2219_v16  ;;  %v1547_v23 = vadd.f32 %v3071_v38, %v1476_v36 }
 0x1a0   : > { %1899 = vst.msk [vmem:[%s2807_s14 + $0xf4] sm:$0xf] %vm1837_vm1, %v2251_v17  ;;  %v1406_v21 = vld [vmem:[#allocation2 + $0xf8] sm:$0xff]  ;;  %v1579_v24 = vadd.f32 %v3071_v38, %v1508_v20 }
 0x1a1   : > { %v1438_v22 = vld [vmem:[#allocation2 + $0x1f8] sm:$0xff]  ;;  %v1477_v25 = vmul.f32 %v3062_v28, %v1406_v21  ;;  %v2220_v27 = vpack.c.bf16 %v1547_v23, %v1547_v23 }
 0x1a2   : > { %v1509_v26 = vmul.f32 %v3062_v28, %v1438_v22  ;;  %v2252_v46 = vpack.c.bf16 %v1579_v24, %v1579_v24 }
 0x1a3   : > { %v1548_v29 = vadd.f32 %v3071_v38, %v1477_v25  ;;  %1868 = vst.msk [vmem:[%s2807_s14 + $0x78] sm:$0xf] %vm1837_vm1, %v2220_v27 }
 0x1a4   : > { %v1580_v30 = vadd.f32 %v3071_v38, %v1509_v26  ;;  %1900 = vst.msk [vmem:[%s2807_s14 + $0xf8] sm:$0xf] %vm1837_vm1, %v2252_v46 }
 0x1a5   : > { %v2221_v31 = vpack.c.bf16 %v1548_v29, %v1548_v29 }
 0x1a6   : > { %v2253_v32 = vpack.c.bf16 %v1580_v30, %v1580_v30 }
 0x1a7   : > { %1869 = vst.msk [vmem:[%s2807_s14 + $0x7c] sm:$0xf] %vm1837_vm1, %v2221_v31 }
 0x1a8   : > { %1901 = vst.msk [vmem:[%s2807_s14 + $0xfc] sm:$0xf] %vm1837_vm1, %v2253_v32 }
 0x1a9 PF: > { %s14_s17 = sadd.s32 1, %s2448_s17   ;;  %s3139_s15 = smov %s2444_s16 }
 0x1aa   : > { %p11_p5 = scmp.ge.s32.totalorder %s14_s17, 4   ;;  %s3140_s16 = smov %s3142_s18 }
 0x1ac   :  { %13 = sbr.rel (!%p11_p5) target bundleno = 2 (0x2), region = 83 }

</bundles_post_ra>
